<compile_context>
chip_gen: v7x
topology: tpu7x:2x2x1
jax: 0.10.0
libtpu: 0.0.40
codegen_flags: <defaults>
</compile_context>

<pallas_src>
import functools

import jax
import jax.numpy as jnp
from jax.experimental import pallas as pl
from jax.experimental.pallas import tpu as pltpu


def _cdiv(a, b):
    return (a + b - 1) // b


def _round_up(a, b):
    return _cdiv(a, b) * b


def _vmem_limit_bytes():
    # Generation-aware: ~3/4 of physical VMEM (~96 MiB v5e/v6e, ~48 MiB v7x).
    try:
        cap = int(pltpu.get_tpu_info().vmem_capacity_bytes)
    except Exception:
        cap = 64 * 1024 * 1024
    return int(min(cap * 3 // 4, 100 * 1024 * 1024))


def _pick_strip_rows(h, w, n, target_steps=8, min_rows=4):
    """Strip height TH: a divisor of H, TH*W multiple of 8 (clean out block),
    enough grid steps for pipelining / megacore, capped so VMEM temps stay small."""
    max_rows = max(min_rows, 2048 // max(w, 1))
    divs = [d for d in range(1, h + 1) if h % d == 0]
    ok = [d for d in divs if (d * w) % 8 == 0 and d <= max_rows]
    good = [d for d in ok if d >= min_rows and n * (h // d) >= target_steps]
    if good:
        return max(good)
    good = [d for d in ok if d >= min_rows]
    if good:
        return min(good)
    return h


def _bcos_layernorm(lin, patch_sq, gamma, inv_scale):
    """B-cos (B=2) nonlinearity + PositionNorm (channel LayerNorm, weight only)."""
    out = lin * jnp.abs(lin) * (jax.lax.rsqrt(patch_sq + 1e-6)
                                * jnp.float32(inv_scale))
    c = out.shape[-1]
    s1 = jnp.sum(out, axis=-1, keepdims=True)
    s2 = jnp.sum(out * out, axis=-1, keepdims=True)
    mean = s1 * (1.0 / c)
    var = jnp.maximum(s2 * (1.0 / c) - mean * mean, 0.0)   # one-pass stats, f32
    out = (out - mean) * jax.lax.rsqrt(var + 1e-5)
    return out * gamma.astype(jnp.float32)


def _bottleneck_kernel(xm_ref, xb1_ref, xb2_ref, w1_ref, w2_ref, w3_ref,
                       g1_ref, g2_ref, g3_ref, o_ref, *,
                       inv_s1, inv_s2, inv_s3, th, w_img, wp):
    cin = w1_ref.shape[0]
    width = w1_ref.shape[1]

    # Assemble the (TH+2)-row halo strip of the zero-padded bf16 NHWC input.
    # xm = TH rows (incl. the top halo row), xb1/xb2 = the two bottom halo rows.
    xs = jnp.concatenate([xm_ref[0], xb1_ref[0], xb2_ref[0]], axis=0)  # [TH+2,Wp,Cin]

    # ---- stage 1: conv1 (1x1 B-cos) + bn1 over every halo-strip position ----
    # Zero-padded rows/cols give exactly-zero out1 (lin=0, ||patch||->eps,
    # LayerNorm(0)=0), which is precisely the zero padding conv2 needs.
    x2d = xs.reshape((th + 2) * wp, cin)                      # bf16, fed to MXU as-is
    lin1 = jnp.dot(x2d, w1_ref[...], preferred_element_type=jnp.float32)
    xf = x2d.astype(jnp.float32)
    ps1 = jnp.sum(xf * xf, axis=-1, keepdims=True)
    out1 = _bcos_layernorm(lin1, ps1, g1_ref[...], inv_s1).astype(jnp.bfloat16)

    # ---- stage 2: conv2 (3x3 B-cos, pad=1) + bn2 ----------------------------
    # dw shifts concatenated along channels => K = 3*width, 3 matmuls over dh.
    o1 = out1.reshape(th + 2, wp, width)
    a = jnp.concatenate([o1[:, dw:dw + w_img, :] for dw in range(3)], axis=-1)
    a2d = a.reshape((th + 2) * w_img, 3 * width)              # bf16
    lin2 = jnp.zeros((th * w_img, width), jnp.float32)
    ps2 = jnp.zeros((th * w_img, 1), jnp.float32)
    for dh in range(3):                                       # unrolled, static offsets
        blk = a2d[dh * w_img:dh * w_img + th * w_img]
        lin2 = lin2 + jnp.dot(blk, w2_ref[dh],
                              preferred_element_type=jnp.float32)
        bf = blk.astype(jnp.float32)
        ps2 = ps2 + jnp.sum(bf * bf, axis=-1, keepdims=True)
    out2 = _bcos_layernorm(lin2, ps2, g2_ref[...], inv_s2).astype(jnp.bfloat16)

    # ---- stage 3: conv3 (1x1 B-cos) + bn3 + residual ------------------------
    lin3 = jnp.dot(out2, w3_ref[...], preferred_element_type=jnp.float32)
    o2f = out2.astype(jnp.float32)
    ps3 = jnp.sum(o2f * o2f, axis=-1, keepdims=True)
    out3 = _bcos_layernorm(lin3, ps3, g3_ref[...], inv_s3)
    ident = xs[1:th + 1, 1:w_img + 1, :].reshape(th * w_img, cin)
    o_ref[0] = (out3 + ident.astype(jnp.float32)).astype(o_ref.dtype)


def bottleneck_forward(x, params, *, target_steps=8):
    """B-cos Bottleneck forward (stride=1, groups=1, dilation=1, downsample=None,
    stochastic_depth_prob=0).  x: [N, C, H, W] float32; returns [N, C, H, W] f32."""
    n, cin, h, w = x.shape
    w1, w2, w3 = params["w1"], params["w2"], params["w3"]
    width = w1.shape[1]
    cout = w3.shape[1]
    assert w1.shape[0] == cin and w2.shape == (3, 3 * width, width)
    assert cout == cin, "downsample=None requires inplanes == planes*expansion"

    th = _pick_strip_rows(h, w, n, target_steps=target_steps)
    ns = h // th
    wp = _round_up(w + 2, 8)  # pad width so in-kernel reshapes are layout-clean

    # Single NCHW -> NHWC layout change, cast to bf16, 1px zero pad on H/W
    # (extra right columns are alignment padding; they stay zero through stage 1
    # and are never read by stage 2).
    # TODO(synk): if the surrounding model kept NHWC activations, this transpose
    # and the one at the end would disappear entirely.
    x_nhwc = jnp.transpose(x, (0, 2, 3, 1)).astype(jnp.bfloat16)
    x_pad = jnp.pad(x_nhwc, ((0, 0), (1, 1), (1, wp - w - 1), (0, 0)))

    g1 = params["g1"].reshape(1, width).astype(jnp.float32)
    g2 = params["g2"].reshape(1, width).astype(jnp.float32)
    g3 = params["g3"].reshape(1, cout).astype(jnp.float32)

    kernel = functools.partial(
        _bottleneck_kernel,
        inv_s1=1.0 / float(params["s1"]),
        inv_s2=1.0 / float(params["s2"]),
        inv_s3=1.0 / float(params["s3"]),
        th=th, w_img=w, wp=wp)

    # Main strip = TH padded rows starting at s*TH (block-aligned); the two
    # remaining halo rows come from two single-row BlockSpecs over the same
    # array (block size 1 => block index == element row).
    main_spec = pl.BlockSpec((1, th, wp, cin), lambda i, s: (i, s, 0, 0))
    halo_b1 = pl.BlockSpec((1, 1, wp, cin), lambda i, s: (i, s * th + th, 0, 0))
    halo_b2 = pl.BlockSpec((1, 1, wp, cin), lambda i, s: (i, s * th + th + 1, 0, 0))

    out = pl.pallas_call(
        kernel,
        out_shape=jax.ShapeDtypeStruct((n, h * w, cout), jnp.float32),
        grid=(n, ns),
        in_specs=[
            main_spec, halo_b1, halo_b2,
            pl.BlockSpec((cin, width), lambda i, s: (0, 0)),            # w1 resident
            pl.BlockSpec((3, 3 * width, width), lambda i, s: (0, 0, 0)),  # w2 resident
            pl.BlockSpec((width, cout), lambda i, s: (0, 0)),           # w3 resident
            pl.BlockSpec((1, width), lambda i, s: (0, 0)),              # gamma1
            pl.BlockSpec((1, width), lambda i, s: (0, 0)),              # gamma2
            pl.BlockSpec((1, cout), lambda i, s: (0, 0)),               # gamma3
        ],
        out_specs=pl.BlockSpec((1, th * w, cout), lambda i, s: (i, s, 0)),
        compiler_params=pltpu.CompilerParams(
            dimension_semantics=("parallel", "parallel"),
            vmem_limit_bytes=_vmem_limit_bytes()),
    )(x_pad, x_pad, x_pad, w1, w2, w3, g1, g2, g3)

    # Single layout change back: NHWC rows -> NCHW f32.
    return jnp.transpose(out.reshape(n, h, w, cout), (0, 3, 1, 2))


def init_params(key, inplanes, planes, base_width=64, groups=1):
    width = int(planes * (base_width / 64.0)) * groups
    out_c = planes * 4  # expansion = 4
    k1, k2, k3 = jax.random.split(key, 3)
    return dict(
        # Conv weights stored in bf16, directly in matmul layout.
        # w1/w3: [Cin, Cout]  (torch weight [Cout, Cin, 1, 1] transposed).
        # w2:    [3, 3*width, width] dw-concat layout:
        #        w2[dh, dw*width + ci, co] = torch_weight[co, ci, dh, dw].
        w1=(jax.random.normal(k1, (inplanes, width), jnp.float32) * 0.1
            ).astype(jnp.bfloat16),
        w2=(jax.random.normal(k2, (3, 3 * width, width), jnp.float32) * 0.1
            ).astype(jnp.bfloat16),
        w3=(jax.random.normal(k3, (width, out_c), jnp.float32) * 0.1
            ).astype(jnp.bfloat16),
        # PositionNorm affine weights (LayerNorm default init = ones, no bias).
        g1=jnp.ones((width,), jnp.float32),
        g2=jnp.ones((width,), jnp.float32),
        g3=jnp.ones((out_c,), jnp.float32),
        # B-cos scale = sqrt(kh*kw*Cin) / 100
        s1=(1 * 1 * inplanes) ** 0.5 / 100.0,
        s2=(3 * 3 * width) ** 0.5 / 100.0,
        s3=(1 * 1 * width) ** 0.5 / 100.0,
    )


if __name__ == "__main__":
    key = jax.random.PRNGKey(0)
    kx, kp = jax.random.split(key)

    # Small shapes: batch=2, planes=16 -> inplanes = planes*expansion = 64
    # (so the residual add is valid without a downsample), spatial 16x16.
    n, planes, h, w = 2, 16, 16, 16
    inplanes = planes * 4

    x = jax.random.normal(kx, (n, inplanes, h, w), jnp.float32)
    params = init_params(kp, inplanes, planes)

    out = bottleneck_forward(x, params)
    out = jax.block_until_ready(out)
    assert out.shape == (n, inplanes, h, w), out.shape
    assert bool(jnp.all(jnp.isfinite(out)))
    print("KERNEL_OK")
</pallas_src>

<mosaic_0001>
module attributes {stable_mosaic.version = 11 : i64} {
  func.func @_bottleneck_kernel(%arg0: i32, %arg1: i32, %arg2: memref<1x4x24x64xbf16, #tpu.memory_space<vmem>>, %arg3: memref<1x1x24x64xbf16, #tpu.memory_space<vmem>>, %arg4: memref<1x1x24x64xbf16, #tpu.memory_space<vmem>>, %arg5: memref<64x16xbf16, #tpu.memory_space<vmem>>, %arg6: memref<3x48x16xbf16, #tpu.memory_space<vmem>>, %arg7: memref<16x64xbf16, #tpu.memory_space<vmem>>, %arg8: memref<1x16xf32, #tpu.memory_space<vmem>>, %arg9: memref<1x16xf32, #tpu.memory_space<vmem>>, %arg10: memref<1x64xf32, #tpu.memory_space<vmem>>, %arg11: memref<1x64x64xf32, #tpu.memory_space<vmem>>) attributes {dimension_semantics = [#tpu.dimension_semantics<parallel>, #tpu.dimension_semantics<parallel>], iteration_bounds = array<i64: 2, 4>, scalar_prefetch = 0 : i64, scratch_operands = 0 : i64, tpu.core_type = #tpu.core_type<tc>, window_params = [{transform_indices = @transform_0, window_bounds = array<i64: 1, 4, 24, 64>}, {transform_indices = @transform_1, window_bounds = array<i64: 1, 1, 24, 64>}, {transform_indices = @transform_2, window_bounds = array<i64: 1, 1, 24, 64>}, {pipeline_mode = #tpu.pipeline_mode<synchronous>, transform_indices = @transform_3, window_bounds = array<i64: 64, 16>}, {pipeline_mode = #tpu.pipeline_mode<synchronous>, transform_indices = @transform_4, window_bounds = array<i64: 3, 48, 16>}, {pipeline_mode = #tpu.pipeline_mode<synchronous>, transform_indices = @transform_5, window_bounds = array<i64: 16, 64>}, {pipeline_mode = #tpu.pipeline_mode<synchronous>, transform_indices = @transform_6, window_bounds = array<i64: 1, 16>}, {pipeline_mode = #tpu.pipeline_mode<synchronous>, transform_indices = @transform_7, window_bounds = array<i64: 1, 16>}, {pipeline_mode = #tpu.pipeline_mode<synchronous>, transform_indices = @transform_8, window_bounds = array<i64: 1, 64>}, {transform_indices = @transform_9, window_bounds = array<i64: 1, 64, 64>}]} {
    %c0 = arith.constant 0 : index
    %c0_0 = arith.constant 0 : index
    %c0_1 = arith.constant 0 : index
    %c0_2 = arith.constant 0 : index
    %0 = vector.load %arg2[%c0, %c0_0, %c0_1, %c0_2] : memref<1x4x24x64xbf16, #tpu.memory_space<vmem>>, vector<1x4x24x64xbf16>
    %1 = vector.shape_cast %0 : vector<1x4x24x64xbf16> to vector<4x24x64xbf16>
    %c0_3 = arith.constant 0 : index
    %c0_4 = arith.constant 0 : index
    %c0_5 = arith.constant 0 : index
    %c0_6 = arith.constant 0 : index
    %2 = vector.load %arg3[%c0_3, %c0_4, %c0_5, %c0_6] : memref<1x1x24x64xbf16, #tpu.memory_space<vmem>>, vector<1x1x24x64xbf16>
    %3 = vector.shape_cast %2 : vector<1x1x24x64xbf16> to vector<1x24x64xbf16>
    %c0_7 = arith.constant 0 : index
    %c0_8 = arith.constant 0 : index
    %c0_9 = arith.constant 0 : index
    %c0_10 = arith.constant 0 : index
    %4 = vector.load %arg4[%c0_7, %c0_8, %c0_9, %c0_10] : memref<1x1x24x64xbf16, #tpu.memory_space<vmem>>, vector<1x1x24x64xbf16>
    %5 = vector.shape_cast %4 : vector<1x1x24x64xbf16> to vector<1x24x64xbf16>
    %6 = tpu.concatenate %1, %3, %5 in 0 : vector<4x24x64xbf16>, vector<1x24x64xbf16>, vector<1x24x64xbf16> -> vector<6x24x64xbf16>
    %7 = vector.shape_cast %6 : vector<6x24x64xbf16> to vector<144x64xbf16>
    %c0_11 = arith.constant 0 : index
    %c0_12 = arith.constant 0 : index
    %8 = vector.load %arg5[%c0_11, %c0_12] : memref<64x16xbf16, #tpu.memory_space<vmem>>, vector<64x16xbf16>
    %cst = arith.constant dense<0.000000e+00> : vector<144x16xf32>
    %9 = tpu.matmul %7, %8, %cst {dimension_numbers = #tpu.dot_dimension_numbers<[1], [0], [0], [1], [0, 0, 1, 1], [], []>} : vector<144x64xbf16>, vector<64x16xbf16>, vector<144x16xf32> -> vector<144x16xf32>
    %10 = arith.extf %7 : vector<144x64xbf16> to vector<144x64xf32>
    %11 = arith.mulf %10, %10 : vector<144x64xf32>
    %cst_13 = arith.constant dense<0.000000e+00> : vector<144xf32>
    %12 = vector.multi_reduction <add>, %11, %cst_13 [1] : vector<144x64xf32> to vector<144xf32>
    %13 = vector.shape_cast %12 : vector<144xf32> to vector<144x1xf32>
    %c0_14 = arith.constant 0 : index
    %c0_15 = arith.constant 0 : index
    %14 = vector.load %arg8[%c0_14, %c0_15] : memref<1x16xf32, #tpu.memory_space<vmem>>, vector<1x16xf32>
    %15 = math.absf %9 : vector<144x16xf32>
    %16 = arith.mulf %9, %15 : vector<144x16xf32>
    %cst_16 = arith.constant 9.99999997E-7 : f32
    %17 = vector.broadcast %cst_16 : f32 to vector<144x1xf32>
    %18 = arith.addf %13, %17 : vector<144x1xf32>
    %19 = math.rsqrt %18 : vector<144x1xf32>
    %cst_17 = arith.constant 1.250000e+01 : f32
    %20 = vector.broadcast %cst_17 : f32 to vector<144x1xf32>
    %21 = arith.mulf %19, %20 : vector<144x1xf32>
    %22 = vector.broadcast %21 : vector<144x1xf32> to vector<144x16xf32>
    %23 = arith.mulf %16, %22 : vector<144x16xf32>
    %cst_18 = arith.constant dense<0.000000e+00> : vector<144xf32>
    %24 = vector.multi_reduction <add>, %23, %cst_18 [1] : vector<144x16xf32> to vector<144xf32>
    %25 = vector.shape_cast %24 : vector<144xf32> to vector<144x1xf32>
    %26 = arith.mulf %23, %23 : vector<144x16xf32>
    %cst_19 = arith.constant dense<0.000000e+00> : vector<144xf32>
    %27 = vector.multi_reduction <add>, %26, %cst_19 [1] : vector<144x16xf32> to vector<144xf32>
    %28 = vector.shape_cast %27 : vector<144xf32> to vector<144x1xf32>
    %cst_20 = arith.constant 6.250000e-02 : f32
    %29 = vector.broadcast %cst_20 : f32 to vector<144x1xf32>
    %30 = arith.mulf %25, %29 : vector<144x1xf32>
    %cst_21 = arith.constant 6.250000e-02 : f32
    %31 = vector.broadcast %cst_21 : f32 to vector<144x1xf32>
    %32 = arith.mulf %28, %31 : vector<144x1xf32>
    %33 = arith.mulf %30, %30 : vector<144x1xf32>
    %34 = arith.subf %32, %33 : vector<144x1xf32>
    %cst_22 = arith.constant 0.000000e+00 : f32
    %35 = vector.broadcast %cst_22 : f32 to vector<144x1xf32>
    %36 = arith.maximumf %34, %35 : vector<144x1xf32>
    %37 = vector.broadcast %30 : vector<144x1xf32> to vector<144x16xf32>
    %38 = arith.subf %23, %37 : vector<144x16xf32>
    %cst_23 = arith.constant 9.99999974E-6 : f32
    %39 = vector.broadcast %cst_23 : f32 to vector<144x1xf32>
    %40 = arith.addf %36, %39 : vector<144x1xf32>
    %41 = math.rsqrt %40 : vector<144x1xf32>
    %42 = vector.broadcast %41 : vector<144x1xf32> to vector<144x16xf32>
    %43 = arith.mulf %38, %42 : vector<144x16xf32>
    %44 = vector.broadcast %14 : vector<1x16xf32> to vector<144x16xf32>
    %45 = arith.mulf %43, %44 : vector<144x16xf32>
    %46 = arith.truncf %45 : vector<144x16xf32> to vector<144x16xbf16>
    %47 = vector.shape_cast %46 : vector<144x16xbf16> to vector<6x24x16xbf16>
    %48 = vector.extract_strided_slice %47 {offsets = [0, 0, 0], sizes = [6, 16, 16], strides = [1, 1, 1]} : vector<6x24x16xbf16> to vector<6x16x16xbf16>
    %49 = vector.extract_strided_slice %47 {offsets = [0, 1, 0], sizes = [6, 16, 16], strides = [1, 1, 1]} : vector<6x24x16xbf16> to vector<6x16x16xbf16>
    %50 = vector.extract_strided_slice %47 {offsets = [0, 2, 0], sizes = [6, 16, 16], strides = [1, 1, 1]} : vector<6x24x16xbf16> to vector<6x16x16xbf16>
    %51 = tpu.concatenate %48, %49, %50 in 2 : vector<6x16x16xbf16>, vector<6x16x16xbf16>, vector<6x16x16xbf16> -> vector<6x16x48xbf16>
    %52 = vector.shape_cast %51 : vector<6x16x48xbf16> to vector<96x48xbf16>
    %cst_24 = arith.constant 0.000000e+00 : f32
    %53 = vector.broadcast %cst_24 : f32 to vector<64x16xf32>
    %cst_25 = arith.constant 0.000000e+00 : f32
    %54 = vector.broadcast %cst_25 : f32 to vector<64x1xf32>
    %55 = vector.extract_strided_slice %52 {offsets = [0, 0], sizes = [64, 48], strides = [1, 1]} : vector<96x48xbf16> to vector<64x48xbf16>
    %c0_26 = arith.constant 0 : index
    %c0_27 = arith.constant 0 : index
    %c0_28 = arith.constant 0 : index
    %56 = vector.load %arg6[%c0_26, %c0_27, %c0_28] : memref<3x48x16xbf16, #tpu.memory_space<vmem>>, vector<1x48x16xbf16>
    %57 = vector.shape_cast %56 : vector<1x48x16xbf16> to vector<48x16xbf16>
    %cst_29 = arith.constant dense<0.000000e+00> : vector<64x16xf32>
    %58 = tpu.matmul %55, %57, %cst_29 {dimension_numbers = #tpu.dot_dimension_numbers<[1], [0], [0], [1], [0, 0, 1, 1], [], []>} : vector<64x48xbf16>, vector<48x16xbf16>, vector<64x16xf32> -> vector<64x16xf32>
    %59 = arith.addf %53, %58 : vector<64x16xf32>
    %60 = arith.extf %55 : vector<64x48xbf16> to vector<64x48xf32>
    %61 = arith.mulf %60, %60 : vector<64x48xf32>
    %cst_30 = arith.constant dense<0.000000e+00> : vector<64xf32>
    %62 = vector.multi_reduction <add>, %61, %cst_30 [1] : vector<64x48xf32> to vector<64xf32>
    %63 = vector.shape_cast %62 : vector<64xf32> to vector<64x1xf32>
    %64 = arith.addf %54, %63 : vector<64x1xf32>
    %65 = vector.extract_strided_slice %52 {offsets = [16, 0], sizes = [64, 48], strides = [1, 1]} : vector<96x48xbf16> to vector<64x48xbf16>
    %c1 = arith.constant 1 : index
    %c0_31 = arith.constant 0 : index
    %c0_32 = arith.constant 0 : index
    %66 = vector.load %arg6[%c1, %c0_31, %c0_32] : memref<3x48x16xbf16, #tpu.memory_space<vmem>>, vector<1x48x16xbf16>
    %67 = vector.shape_cast %66 : vector<1x48x16xbf16> to vector<48x16xbf16>
    %cst_33 = arith.constant dense<0.000000e+00> : vector<64x16xf32>
    %68 = tpu.matmul %65, %67, %cst_33 {dimension_numbers = #tpu.dot_dimension_numbers<[1], [0], [0], [1], [0, 0, 1, 1], [], []>} : vector<64x48xbf16>, vector<48x16xbf16>, vector<64x16xf32> -> vector<64x16xf32>
    %69 = arith.addf %59, %68 : vector<64x16xf32>
    %70 = arith.extf %65 : vector<64x48xbf16> to vector<64x48xf32>
    %71 = arith.mulf %70, %70 : vector<64x48xf32>
    %cst_34 = arith.constant dense<0.000000e+00> : vector<64xf32>
    %72 = vector.multi_reduction <add>, %71, %cst_34 [1] : vector<64x48xf32> to vector<64xf32>
    %73 = vector.shape_cast %72 : vector<64xf32> to vector<64x1xf32>
    %74 = arith.addf %64, %73 : vector<64x1xf32>
    %75 = vector.extract_strided_slice %52 {offsets = [32, 0], sizes = [64, 48], strides = [1, 1]} : vector<96x48xbf16> to vector<64x48xbf16>
    %c2 = arith.constant 2 : index
    %c0_35 = arith.constant 0 : index
    %c0_36 = arith.constant 0 : index
    %76 = vector.load %arg6[%c2, %c0_35, %c0_36] : memref<3x48x16xbf16, #tpu.memory_space<vmem>>, vector<1x48x16xbf16>
    %77 = vector.shape_cast %76 : vector<1x48x16xbf16> to vector<48x16xbf16>
    %cst_37 = arith.constant dense<0.000000e+00> : vector<64x16xf32>
    %78 = tpu.matmul %75, %77, %cst_37 {dimension_numbers = #tpu.dot_dimension_numbers<[1], [0], [0], [1], [0, 0, 1, 1], [], []>} : vector<64x48xbf16>, vector<48x16xbf16>, vector<64x16xf32> -> vector<64x16xf32>
    %79 = arith.addf %69, %78 : vector<64x16xf32>
    %80 = arith.extf %75 : vector<64x48xbf16> to vector<64x48xf32>
    %81 = arith.mulf %80, %80 : vector<64x48xf32>
    %cst_38 = arith.constant dense<0.000000e+00> : vector<64xf32>
    %82 = vector.multi_reduction <add>, %81, %cst_38 [1] : vector<64x48xf32> to vector<64xf32>
    %83 = vector.shape_cast %82 : vector<64xf32> to vector<64x1xf32>
    %84 = arith.addf %74, %83 : vector<64x1xf32>
    %c0_39 = arith.constant 0 : index
    %c0_40 = arith.constant 0 : index
    %85 = vector.load %arg9[%c0_39, %c0_40] : memref<1x16xf32, #tpu.memory_space<vmem>>, vector<1x16xf32>
    %86 = math.absf %79 : vector<64x16xf32>
    %87 = arith.mulf %79, %86 : vector<64x16xf32>
    %cst_41 = arith.constant 9.99999997E-7 : f32
    %88 = vector.broadcast %cst_41 : f32 to vector<64x1xf32>
    %89 = arith.addf %84, %88 : vector<64x1xf32>
    %90 = math.rsqrt %89 : vector<64x1xf32>
    %cst_42 = arith.constant 8.33333301 : f32
    %91 = vector.broadcast %cst_42 : f32 to vector<64x1xf32>
    %92 = arith.mulf %90, %91 : vector<64x1xf32>
    %93 = vector.broadcast %92 : vector<64x1xf32> to vector<64x16xf32>
    %94 = arith.mulf %87, %93 : vector<64x16xf32>
    %cst_43 = arith.constant dense<0.000000e+00> : vector<64xf32>
    %95 = vector.multi_reduction <add>, %94, %cst_43 [1] : vector<64x16xf32> to vector<64xf32>
    %96 = vector.shape_cast %95 : vector<64xf32> to vector<64x1xf32>
    %97 = arith.mulf %94, %94 : vector<64x16xf32>
    %cst_44 = arith.constant dense<0.000000e+00> : vector<64xf32>
    %98 = vector.multi_reduction <add>, %97, %cst_44 [1] : vector<64x16xf32> to vector<64xf32>
    %99 = vector.shape_cast %98 : vector<64xf32> to vector<64x1xf32>
    %cst_45 = arith.constant 6.250000e-02 : f32
    %100 = vector.broadcast %cst_45 : f32 to vector<64x1xf32>
    %101 = arith.mulf %96, %100 : vector<64x1xf32>
    %cst_46 = arith.constant 6.250000e-02 : f32
    %102 = vector.broadcast %cst_46 : f32 to vector<64x1xf32>
    %103 = arith.mulf %99, %102 : vector<64x1xf32>
    %104 = arith.mulf %101, %101 : vector<64x1xf32>
    %105 = arith.subf %103, %104 : vector<64x1xf32>
    %cst_47 = arith.constant 0.000000e+00 : f32
    %106 = vector.broadcast %cst_47 : f32 to vector<64x1xf32>
    %107 = arith.maximumf %105, %106 : vector<64x1xf32>
    %108 = vector.broadcast %101 : vector<64x1xf32> to vector<64x16xf32>
    %109 = arith.subf %94, %108 : vector<64x16xf32>
    %cst_48 = arith.constant 9.99999974E-6 : f32
    %110 = vector.broadcast %cst_48 : f32 to vector<64x1xf32>
    %111 = arith.addf %107, %110 : vector<64x1xf32>
    %112 = math.rsqrt %111 : vector<64x1xf32>
    %113 = vector.broadcast %112 : vector<64x1xf32> to vector<64x16xf32>
    %114 = arith.mulf %109, %113 : vector<64x16xf32>
    %115 = vector.broadcast %85 : vector<1x16xf32> to vector<64x16xf32>
    %116 = arith.mulf %114, %115 : vector<64x16xf32>
    %117 = arith.truncf %116 : vector<64x16xf32> to vector<64x16xbf16>
    %c0_49 = arith.constant 0 : index
    %c0_50 = arith.constant 0 : index
    %118 = vector.load %arg7[%c0_49, %c0_50] : memref<16x64xbf16, #tpu.memory_space<vmem>>, vector<16x64xbf16>
    %cst_51 = arith.constant dense<0.000000e+00> : vector<64x64xf32>
    %119 = tpu.matmul %117, %118, %cst_51 {dimension_numbers = #tpu.dot_dimension_numbers<[1], [0], [0], [1], [0, 0, 1, 1], [], []>} : vector<64x16xbf16>, vector<16x64xbf16>, vector<64x64xf32> -> vector<64x64xf32>
    %120 = arith.extf %117 : vector<64x16xbf16> to vector<64x16xf32>
    %121 = arith.mulf %120, %120 : vector<64x16xf32>
    %cst_52 = arith.constant dense<0.000000e+00> : vector<64xf32>
    %122 = vector.multi_reduction <add>, %121, %cst_52 [1] : vector<64x16xf32> to vector<64xf32>
    %123 = vector.shape_cast %122 : vector<64xf32> to vector<64x1xf32>
    %c0_53 = arith.constant 0 : index
    %c0_54 = arith.constant 0 : index
    %124 = vector.load %arg10[%c0_53, %c0_54] : memref<1x64xf32, #tpu.memory_space<vmem>>, vector<1x64xf32>
    %125 = math.absf %119 : vector<64x64xf32>
    %126 = arith.mulf %119, %125 : vector<64x64xf32>
    %cst_55 = arith.constant 9.99999997E-7 : f32
    %127 = vector.broadcast %cst_55 : f32 to vector<64x1xf32>
    %128 = arith.addf %123, %127 : vector<64x1xf32>
    %129 = math.rsqrt %128 : vector<64x1xf32>
    %cst_56 = arith.constant 2.500000e+01 : f32
    %130 = vector.broadcast %cst_56 : f32 to vector<64x1xf32>
    %131 = arith.mulf %129, %130 : vector<64x1xf32>
    %132 = vector.broadcast %131 : vector<64x1xf32> to vector<64x64xf32>
    %133 = arith.mulf %126, %132 : vector<64x64xf32>
    %cst_57 = arith.constant dense<0.000000e+00> : vector<64xf32>
    %134 = vector.multi_reduction <add>, %133, %cst_57 [1] : vector<64x64xf32> to vector<64xf32>
    %135 = vector.shape_cast %134 : vector<64xf32> to vector<64x1xf32>
    %136 = arith.mulf %133, %133 : vector<64x64xf32>
    %cst_58 = arith.constant dense<0.000000e+00> : vector<64xf32>
    %137 = vector.multi_reduction <add>, %136, %cst_58 [1] : vector<64x64xf32> to vector<64xf32>
    %138 = vector.shape_cast %137 : vector<64xf32> to vector<64x1xf32>
    %cst_59 = arith.constant 1.562500e-02 : f32
    %139 = vector.broadcast %cst_59 : f32 to vector<64x1xf32>
    %140 = arith.mulf %135, %139 : vector<64x1xf32>
    %cst_60 = arith.constant 1.562500e-02 : f32
    %141 = vector.broadcast %cst_60 : f32 to vector<64x1xf32>
    %142 = arith.mulf %138, %141 : vector<64x1xf32>
    %143 = arith.mulf %140, %140 : vector<64x1xf32>
    %144 = arith.subf %142, %143 : vector<64x1xf32>
    %cst_61 = arith.constant 0.000000e+00 : f32
    %145 = vector.broadcast %cst_61 : f32 to vector<64x1xf32>
    %146 = arith.maximumf %144, %145 : vector<64x1xf32>
    %147 = vector.broadcast %140 : vector<64x1xf32> to vector<64x64xf32>
    %148 = arith.subf %133, %147 : vector<64x64xf32>
    %cst_62 = arith.constant 9.99999974E-6 : f32
    %149 = vector.broadcast %cst_62 : f32 to vector<64x1xf32>
    %150 = arith.addf %146, %149 : vector<64x1xf32>
    %151 = math.rsqrt %150 : vector<64x1xf32>
    %152 = vector.broadcast %151 : vector<64x1xf32> to vector<64x64xf32>
    %153 = arith.mulf %148, %152 : vector<64x64xf32>
    %154 = vector.broadcast %124 : vector<1x64xf32> to vector<64x64xf32>
    %155 = arith.mulf %153, %154 : vector<64x64xf32>
    %156 = vector.extract_strided_slice %6 {offsets = [1, 1, 0], sizes = [4, 16, 64], strides = [1, 1, 1]} : vector<6x24x64xbf16> to vector<4x16x64xbf16>
    %157 = vector.shape_cast %156 : vector<4x16x64xbf16> to vector<64x64xbf16>
    %158 = arith.extf %157 : vector<64x64xbf16> to vector<64x64xf32>
    %159 = arith.addf %155, %158 : vector<64x64xf32>
    %c0_63 = arith.constant 0 : index
    %c0_64 = arith.constant 0 : index
    %c0_65 = arith.constant 0 : index
    %160 = vector.load %arg11[%c0_63, %c0_64, %c0_65] : memref<1x64x64xf32, #tpu.memory_space<vmem>>, vector<1x64x64xf32>
    %161 = vector.shape_cast %160 : vector<1x64x64xf32> to vector<64x64xf32>
    %162 = vector.shape_cast %159 : vector<64x64xf32> to vector<1x64x64xf32>
    tpu.vector_store %arg11[%c0_63, %c0_64, %c0_65], %162 {strides = array<i32>} : memref<1x64x64xf32, #tpu.memory_space<vmem>>, vector<1x64x64xf32>,
    return
  }
  func.func @transform_0(%arg0: i32, %arg1: i32) -> (i32, i32, i32, i32) {
    %c0_i32 = arith.constant 0 : i32
    %c0_i32_0 = arith.constant 0 : i32
    %c0_i32_1 = arith.constant 0 : i32
    return %arg0, %arg1, %c0_i32, %c0_i32_0 : i32, i32, i32, i32
  }
  func.func @transform_1(%arg0: i32, %arg1: i32) -> (i32, i32, i32, i32) {
    %c4_i32 = arith.constant 4 : i32
    %0 = arith.muli %arg1, %c4_i32 : i32
    %c4_i32_0 = arith.constant 4 : i32
    %1 = arith.addi %0, %c4_i32_0 : i32
    %c0_i32 = arith.constant 0 : i32
    %c0_i32_1 = arith.constant 0 : i32
    %c0_i32_2 = arith.constant 0 : i32
    return %arg0, %1, %c0_i32, %c0_i32_1 : i32, i32, i32, i32
  }
  func.func @transform_2(%arg0: i32, %arg1: i32) -> (i32, i32, i32, i32) {
    %c4_i32 = arith.constant 4 : i32
    %0 = arith.muli %arg1, %c4_i32 : i32
    %c4_i32_0 = arith.constant 4 : i32
    %1 = arith.addi %0, %c4_i32_0 : i32
    %c1_i32 = arith.constant 1 : i32
    %2 = arith.addi %1, %c1_i32 : i32
    %c0_i32 = arith.constant 0 : i32
    %c0_i32_1 = arith.constant 0 : i32
    %c0_i32_2 = arith.constant 0 : i32
    return %arg0, %2, %c0_i32, %c0_i32_1 : i32, i32, i32, i32
  }
  func.func @transform_3(%arg0: i32, %arg1: i32) -> (i32, i32) {
    %c0_i32 = arith.constant 0 : i32
    %c0_i32_0 = arith.constant 0 : i32
    %c0_i32_1 = arith.constant 0 : i32
    return %c0_i32, %c0_i32_0 : i32, i32
  }
  func.func @transform_4(%arg0: i32, %arg1: i32) -> (i32, i32, i32) {
    %c0_i32 = arith.constant 0 : i32
    %c0_i32_0 = arith.constant 0 : i32
    %c0_i32_1 = arith.constant 0 : i32
    %c0_i32_2 = arith.constant 0 : i32
    return %c0_i32, %c0_i32_0, %c0_i32_1 : i32, i32, i32
  }
  func.func @transform_5(%arg0: i32, %arg1: i32) -> (i32, i32) {
    %c0_i32 = arith.constant 0 : i32
    %c0_i32_0 = arith.constant 0 : i32
    %c0_i32_1 = arith.constant 0 : i32
    return %c0_i32, %c0_i32_0 : i32, i32
  }
  func.func @transform_6(%arg0: i32, %arg1: i32) -> (i32, i32) {
    %c0_i32 = arith.constant 0 : i32
    %c0_i32_0 = arith.constant 0 : i32
    %c0_i32_1 = arith.constant 0 : i32
    return %c0_i32, %c0_i32_0 : i32, i32
  }
  func.func @transform_7(%arg0: i32, %arg1: i32) -> (i32, i32) {
    %c0_i32 = arith.constant 0 : i32
    %c0_i32_0 = arith.constant 0 : i32
    %c0_i32_1 = arith.constant 0 : i32
    return %c0_i32, %c0_i32_0 : i32, i32
  }
  func.func @transform_8(%arg0: i32, %arg1: i32) -> (i32, i32) {
    %c0_i32 = arith.constant 0 : i32
    %c0_i32_0 = arith.constant 0 : i32
    %c0_i32_1 = arith.constant 0 : i32
    return %c0_i32, %c0_i32_0 : i32, i32
  }
  func.func @transform_9(%arg0: i32, %arg1: i32) -> (i32, i32, i32) {
    %c0_i32 = arith.constant 0 : i32
    %c0_i32_0 = arith.constant 0 : i32
    return %arg0, %arg1, %c0_i32 : i32, i32, i32
  }
}

</mosaic_0001>

<bundles_post_ra>
// kernel: tpu_custom_call.1
= control target key start
LH: loop header
LB: loop body
LE: loop exit
PB: predicated region body
PF: predicated region fallthrough
CT: control target
= control target key end

     0   :  { %s4677_s0 = inlined_call_operand.hbm [shape: bf16[2,18,24,64], index: 0, kind: input, shape index: {}]   ;;  %s4678_s1 = inlined_call_operand.hbm [shape: bf16[2,18,24,64], index: 1, kind: input, shape index: {}]   ;;  %s4679_s2 = inlined_call_operand.hbm [shape: bf16[2,18,24,64], index: 2, kind: input, shape index: {}]   ;;  %s4680_s3 = inlined_call_operand.vmem [shape: bf16[64,16], index: 3, kind: input, shape index: {}]   ;;  %s4681_s4 = inlined_call_operand.vmem [shape: bf16[3,48,16], index: 4, kind: input, shape index: {}]   ;;  %s4682_s5 = inlined_call_operand.vmem [shape: bf16[16,64], index: 5, kind: input, shape index: {}]   ;;  %s4683_s6 = inlined_call_operand.vmem [shape: f32[1,16], index: 6, kind: input, shape index: {}]   ;;  %s4684_s7 = inlined_call_operand.vmem [shape: f32[1,16], index: 7, kind: input, shape index: {}]   ;;  %s4685_s8 = inlined_call_operand.vmem [shape: f32[1,64], index: 8, kind: input, shape index: {}]   ;;  %s4686_s9 = inlined_call_operand.vmem [shape: f32[2,256,64], index: 9, kind: output, shape index: {}]  }
   0x1   :  { %4700 = sst [smem:[#allocation20_spill]] %s4680_s3 }
   0x2   :  { %4701 = sst [smem:[#allocation21_spill]] %s4681_s4 }
   0x3   :  { %4702 = sst [smem:[#allocation22_spill]] %s4682_s5 }
   0x4   :  { %4703 = sst [smem:[#allocation23_spill]] %s4683_s6 }
   0x5   :  { %4704 = sst [smem:[#allocation24_spill]] %s4684_s7 }
   0x6   :  { %4705 = sst [smem:[#allocation25_spill]] %s4685_s8 }
   0x7   :  { %4706 = sst [smem:[#allocation26_spill]] %s4686_s9 }
   0x8   :  { %14 = vsyncpa [#allocation3], 0 }
   0x9   :  { %16 = vsyncpa [#allocation3 + $0x1], 0 }
   0xa   :  { %17 = vsyncpa [#allocation5], 0 }
   0xb   :  { %19 = vsyncpa [#allocation5 + $0x1], 0  ;;  %s3420_s30 = smov 0   ;;  %s3422_s10 = smov 0  }
   0xc   :  { %s3424_s11 = smov 0   ;;  %s3426_s12 = smov 0  }
   0xd   :  { %s3428_s13 = smov 0   ;;  %s3430_s14 = smov 0  }
   0xe   :  { %s3432_s15 = smov 0   ;;  %s3434_s16 = smov 0  }
   0xf   :  { %s3436_s17 = smov 0   ;;  %s3438_s18 = smov 0  }
  0x10   :  { %s3440_s19 = smov 0   ;;  %s3442_s20 = smov 0  }
  0x11   :  { %s3444_s21 = smov 0   ;;  %s3446_s22 = smov 0  }
  0x12 LB: > { %4707 = sst [smem:[#allocation10_spill]] %s3309_s10  ;;  %s4687_s23 = sadd.s32 4294967295, %s3357_s22   ;;  %s3357_s22 = sphi %s3446_s22, %s25_s22   ;;  %s3353_s21 = sphi %s3444_s21, %s4765_s21   ;;  %s3349_s20 = sphi %s3442_s20, %s4764_s20   ;;  %s3345_s19 = sphi %s3440_s19, %s4763_s19   ;;  %s3341_s18 = sphi %s3438_s18, %s4762_s18   ;;  %s3337_s17 = sphi %s3436_s17, %s4750_s17   ;;  %s3333_s16 = sphi %s3434_s16, %s4761_s16   ;;  %s3329_s15 = sphi %s3432_s15, %s4760_s15   ;;  %s3325_s14 = sphi %s3430_s14, %s4759_s14   ;;  %s3321_s13 = sphi %s3428_s13, %s4758_s13   ;;  %s3317_s12 = sphi %s3426_s12, %s4757_s12   ;;  %s3313_s11 = sphi %s3424_s11, %s4756_s11   ;;  %s3309_s10 = sphi %s3422_s10, %s4755_s10   ;;  %s3305_s30 = sphi %s3420_s30, %s4754_s30  }
  0x13   : > { %4708 = sst [smem:[#allocation11_spill]] %s3337_s17  ;;  %s34_s24 = sadd.s32 1, %s3349_s20 }
  0x14   : > { %4709 = sst [smem:[#allocation12_spill]] %s3341_s18  ;;  %p35_p0 = scmp.ge.s32.totalorder %s34_s24, 4 }
  0x15   : > { %4710 = sst [smem:[#allocation13_spill]] %s3345_s19  ;;  %s37_s25 = sadd.s32 1, %s3353_s21 }
  0x16   : > { %s46_s26 = sadd.s32 1, %s3337_s17  ;;  %p53_p1 = scmp.ne.s32.totalorder %s3337_s17, %s3333_s16 }
  0x17   : > { %s4767_s24 = smov (%p35_p0, %s34_s24), 0  ;;  %s4769_s25 = smov (!%p35_p0, %s37_s25), %s3353_s21 }
  0x18   : > { %4711 = sst [smem:[#allocation14_spill]] %s4767_s24  ;;  %s42_s27 = ssub.s32 %s3349_s20, %s4767_s24 }
  0x19   : > { %p54_p2 = scmp.eq.s32.totalorder %s3357_s22, 0  ;;  %p39_p3 = scmp.ge.s32.totalorder %s4769_s25, 2 }
  0x1a   : > { %p59_p4 = scmp.ne.s32.totalorder %s3333_s16, %s3329_s15  ;;  %p3509_p6 = scmp.eq.s32.totalorder %s4687_s23, 0 }
  0x1b   : > { %p3503_p5 = por %p54_p2, %p53_p1  ;;  %s4771_s25 = smov (%p39_p3, %s4769_s25), 0 }
  0x1c   : > { %4714 = sst [smem:[#allocation15_spill]] %s4771_s25  ;;  %p3517_p7 = por %p3509_p6, %p59_p4 }
  0x1d   : > { %s2601_s9 = sshll.u32 %s3349_s20, 2  ;;  %s41_s8 = ssub.s32 %s3353_s21, %s4771_s25 }
  0x1e   : > { %s4715_s15 = scalar_select %p3517_p7, 1, 0 }
  0x1f   : > { %s70_s23 = sadd.s32 4, %s2601_s9  ;;  %s43_s19 = sor.u32 %s42_s27, %s41_s8 }
  0x20   : > { %s2602_s18 = sshll.u32 %s4767_s24, 2  ;;  %p44_p8 = scmp.eq.s32.totalorder %s43_s19, 0 }
  0x21   : > { %s72_s7 = sadd.s32 4, %s2602_s18  ;;  %s78_s4 = sadd.s32 1, %s3325_s14 }
  0x22   : > { %s74_s5 = ssub.s32 %s70_s23, %s72_s7  ;;  %p85_p9 = scmp.ne.s32.totalorder %s3325_s14, %s3321_s13 }
  0x23   : > { %s3527_s6 = scalar_select %p44_p8, %s3337_s17, %s46_s26  }
  0x24   : > { %s75_s3 = sor.u32 %s74_s5, %s41_s8  ;;  %p91_p11 = scmp.ne.s32.totalorder %s3321_s13, %s3317_s12 }
  0x25   : > { %4716 = sst [smem:[#allocation16_spill]] %s3527_s6  ;;  %p76_p10 = scmp.eq.s32.totalorder %s75_s3, 0 }
  0x26   : > { %p3535_p12 = por %p85_p9, %p54_p2  ;;  %s102_s19 = sadd.s32 5, %s2601_s9 }
  0x27   : > { %s3540_s25 = scalar_select %p76_p10, %s3325_s14, %s78_s4  }
  0x28   : > { %p3544_p13 = por %p91_p11, %p3509_p6  ;;  %s104_s23 = sadd.s32 5, %s2602_s18 }
  0x29   : > { %4718 = sst [smem:[#allocation17_spill]] %s3540_s25  ;;  %s106_s5 = ssub.s32 %s102_s19, %s104_s23 }
  0x2a   : > { %s4719_s7 = scalar_select %p3544_p13, 1, 0 }
  0x2b   : > { %s110_s26 = sadd.s32 1, %s3313_s11  ;;  %s107_s24 = sor.u32 %s106_s5, %s41_s8 }
  0x2c   : > { %p117_p0 = scmp.ne.s32.totalorder %s3313_s11, %s3309_s10  ;;  %p108_p1 = scmp.eq.s32.totalorder %s107_s24, 0 }
  0x2d   : > { %p123_p3 = scmp.ne.s32.totalorder %s3309_s10, %s3305_s30  ;;  %p2606_p9 = scmp.ge.s32.totalorder %s3357_s22, 8 }
  0x2e   : > { %p3555_p4 = por %p117_p0, %p54_p2 }
  0x2f   : > { %s3560_s9 = scalar_select %p108_p1, %s3313_s11, %s110_s26  }
  0x30   : > { %p3564_p8 = por %p123_p3, %p3509_p6  ;;  %315 = sbr.rel (%p2606_p9) target bundleno = 140 (0x8c), region = 40 }
  0x31   : > { %4721 = sst [smem:[#allocation18_spill]] %s3560_s9 }
  0x32   : > { %s4722_s4 = scalar_select %p3564_p8, 1, 0 }
  0x34   : > { %4723 = sst [smem:[#allocation19_spill]] %s4722_s4 }
  0x37   : > { %318 = sbr.rel (!%p3503_p5) target bundleno = 85 (0x55), region = 44  ;;  %s319_s8 = sand.u32 (%p3503_p5), 1, %s3337_s17  }
  0x38   : > { %s2853_s30 = smul.u32 (%p3503_p5), 48, %s319_s8  ;;  %s3572_s12 = scalar_lea.sflag (%p3503_p5), [#allocation3], %s319_s8 }
  0x39   : > { %s2854_s24 = smul.u32 (%p3503_p5), 12, %s3349_s20  ;;  %s3151_s17 = scalar_lea.hbm (%p3503_p5), %s4677_s0, 6912 }
  0x3a   : > { %s323_s18 = scalar_lea.vmem (%p3503_p5), [#allocation2], %s2853_s30  ;;  %s2855_s29 = smul.u32 (%p3503_p5), 54, %s3353_s21 }
  0x3b   : > { %s341_s19 = sshll.u32 (%p3503_p5), %s323_s18, 4  ;;  %s3576_s19 = int_to_ptr.vmem [resolvable:$true] %s341_s19 }
  0x3c   : > { %s336_s23 = sadd.s32 (%p3503_p5), %s2855_s29, %s2854_s24 }
  0x3d   : > { %s2612_s5 = sshll.u32 (%p3503_p5), %s336_s23, 6 }
  0x3e   : > { %s338_s28 = scalar_lea.hbm %s4677_s0, %s2612_s5 }
  0x3f   : > { %s3147_s25 = scalar_lea.hbm %s338_s28, 768  ;;  %p3152_p5 = scmp.lt.u32.totalorder %s338_s28, %s4677_s0 }
  0x40   : > { %p3148_p2 = scmp.ne.s32.totalorder %s338_s28, %s3147_s25  ;;  %p3153_p6 = scmp.lt.u32.totalorder %s3151_s17, %s3147_s25 }
  0x41   : > { %p3155_p11 = scmp.lt.u32.totalorder %s3147_s25, %s338_s28 }
  0x42   : > { %p3154_p10 = por %p3153_p6, %p3152_p5 }
  0x44   : > { %p3156_p0 = por %p3155_p11, %p3154_p10 }
  0x46   : > { %p3157_p1 = pnand %p3156_p0, %p3148_p2 }
  0x48   : > { %3160 = shalt.err (!%p3157_p1)
}
  0x49   : > { %s3161_s6 = scalar_lea.vmem %s3576_s19, 768  ;;  %s3359_s30 = smov [#allocation2]  }
  0x4a   : > { %p3162_p3 = scmp.ne.s32.totalorder %s3576_s19, %s3161_s6  ;;  %s3165_s18 = sshll.u32 %s3359_s30, 4  ;;  %s3166_s18 = int_to_ptr.vmem [resolvable:$false] %s3165_s18 }
  0x4b   : > { %s3167_s9 = scalar_lea.vmem %s3166_s18, 1536  ;;  %p3168_p9 = scmp.lt.s32.totalorder %s3576_s19, %s3166_s18 }
  0x4c   : > { %p3169_p8 = scmp.lt.s32.totalorder %s3167_s9, %s3161_s6 }
  0x4e   : > { %p3170_p13 = por %p3169_p8, %p3168_p9 }
  0x50   : > { %p3171_p7 = pnand %p3170_p13, %p3162_p3 }
  0x52   : > { %3174 = shalt.err (!%p3171_p7)
}
  0x53   : > { %s3360_s10 = smov 64   ;;  %s3361_s17 = smov 4  }
  0x54   : > { %347 = dma.hbm_to_vmem [thread:$0]  %s338_s28, 768, %s3576_s19, %s3572_s12, %s3360_s10, %s3360_s10, %s3361_s17  }
  0x55 PF: > { %s351_s25 = sand.u32 1, %s3357_s22   ;;  %s353_s4 = sand.u32 1, %s3325_s14  }
  0x56   : > { %s2856_s24 = smul.u32 12, %s353_s4  ;;  %s378_s28 = sand.u32 1, %s3313_s11  }
  0x57   : > { %s2616_s29 = smul.u32 12, %s3349_s20  ;;  %s3609_s4 = scalar_lea.sflag [#allocation5], %s351_s25 }
  0x58   : > { %s2497_s23 = smul.u32 54, %s3353_s21  ;;  %s355_s5 = scalar_lea.vmem [#allocation4], %s2856_s24 }
  0x59   : > { %s366_s26 = sshll.u32 %s355_s5, 4  ;;  %s3179_s5 = scalar_lea.hbm %s4678_s1, 6912  ;;  %s3596_s26 = int_to_ptr.vmem [resolvable:$true] %s366_s26 }
  0x5a   : > { %s2498_s8 = sadd.s32 %s2616_s29, %s2497_s23 }
  0x5b   : > { %s2617_s6 = sshll.u32 %s2498_s8, 6 }
  0x5c   : > { %s2500_s19 = scalar_lea.hbm %s4678_s1, %s2617_s6  ;;  %s3607_s17 = scalar_lea.hbm %s4679_s2, %s2617_s6 }
  0x5d   : > { %s3602_s18 = scalar_lea.hbm %s2500_s19, 768  ;;  %s3203_s24 = scalar_lea.hbm %s2500_s19, 960 }
  0x5e   : > { %p3176_p7 = scmp.ne.s32.totalorder %s3602_s18, %s3203_s24  ;;  %p3180_p2 = scmp.lt.u32.totalorder %s3602_s18, %s4678_s1 }
  0x5f   : > { %p3181_p5 = scmp.lt.u32.totalorder %s3179_s5, %s3203_s24  ;;  %p3183_p10 = scmp.lt.u32.totalorder %s3203_s24, %s3602_s18 }
  0x60   : > { %p3177_p13 = pnand %p3176_p7, %p3535_p12 }
  0x61   : > { %p3182_p6 = por %p3181_p5, %p3180_p2 }
  0x62   : > { %p3178_p8 = pneg %p3177_p13 }
  0x63   : > { %p3184_p11 = por %p3183_p10, %p3182_p6 }
  0x65   : > { %p3185_p0 = pnand %p3184_p11, %p3178_p8 }
  0x67   : > { %3188 = shalt.err (!%p3185_p0)
}
  0x68   : > { %s3189_s25 = scalar_lea.vmem %s3596_s26, 192  ;;  %s3362_s6 = smov [#allocation4]  }
  0x69   : > { %p3190_p1 = scmp.ne.s32.totalorder %s3596_s26, %s3189_s25  ;;  %s3193_s12 = sshll.u32 %s3362_s6, 4  ;;  %s3194_s12 = int_to_ptr.vmem [resolvable:$false] %s3193_s12 }
  0x6a   : > { %s3195_s19 = scalar_lea.vmem %s3194_s12, 384  ;;  %p3196_p7 = scmp.lt.s32.totalorder %s3596_s26, %s3194_s12 }
  0x6b   : > { %p3191_p3 = pnand %p3190_p1, %p3535_p12  ;;  %p3197_p13 = scmp.lt.s32.totalorder %s3195_s19, %s3189_s25 }
  0x6d   : > { %p3192_p9 = pneg %p3191_p3  ;;  %p3198_p2 = por %p3197_p13, %p3196_p7 }
  0x6f   : > { %p3199_p5 = pnand %p3198_p2, %p3192_p9 }
  0x71   : > { %3202 = shalt.err (!%p3199_p5)
}
  0x72   : > { %s3363_s9 = smov 64   ;;  %s3364_s10 = smov 4  }
  0x73   : > { %2861 = dma.hbm_to_vmem [thread:$0]  (%p3535_p12), %s3602_s18, 192, %s3596_s26, %s3609_s4, %s3363_s9, %s3363_s9, %s3364_s10  }
  0x74   : > { %s2857_s24 = smul.u32 12, %s378_s28  ;;  %s3638_s29 = scalar_lea.hbm %s3607_s17, 960 }
  0x75   : > { %s3232_s8 = scalar_lea.hbm %s3607_s17, 1152  ;;  %s3208_s26 = scalar_lea.hbm %s4679_s2, 6912 }
  0x76   : > { %s380_s23 = scalar_lea.vmem [#allocation6], %s2857_s24  ;;  %p3205_p8 = scmp.ne.s32.totalorder %s3638_s29, %s3232_s8 }
  0x77   : > { %s391_s5 = sshll.u32 %s380_s23, 4  ;;  %p3209_p12 = scmp.lt.u32.totalorder %s3638_s29, %s4679_s2  ;;  %s3640_s5 = int_to_ptr.vmem [resolvable:$true] %s391_s5 }
  0x78   : > { %p3206_p6 = pnand %p3205_p8, %p3555_p4  ;;  %p3210_p11 = scmp.lt.u32.totalorder %s3208_s26, %s3232_s8 }
  0x79   : > { %p3212_p1 = scmp.lt.u32.totalorder %s3232_s8, %s3638_s29 }
  0x7a   : > { %p3207_p10 = pneg %p3206_p6  ;;  %p3211_p0 = por %p3210_p11, %p3209_p12 }
  0x7c   : > { %p3213_p3 = por %p3212_p1, %p3211_p0 }
  0x7e   : > { %p3214_p9 = pnand %p3213_p3, %p3207_p10 }
  0x80   : > { %3217 = shalt.err (!%p3214_p9)
}
  0x81   : > { %s3218_s17 = scalar_lea.vmem %s3640_s5, 192  ;;  %s3365_s25 = smov [#allocation6]  }
  0x82   : > { %p3219_p7 = scmp.ne.s32.totalorder %s3640_s5, %s3218_s17  ;;  %s3222_s6 = sshll.u32 %s3365_s25, 4  ;;  %s3223_s6 = int_to_ptr.vmem [resolvable:$false] %s3222_s6 }
  0x83   : > { %s3224_s12 = scalar_lea.vmem %s3223_s6, 384  ;;  %p3225_p5 = scmp.lt.s32.totalorder %s3640_s5, %s3223_s6 }
  0x84   : > { %p3220_p13 = pnand %p3219_p7, %p3555_p4  ;;  %p3226_p8 = scmp.lt.s32.totalorder %s3224_s12, %s3218_s17 }
  0x86   : > { %p3221_p2 = pneg %p3220_p13  ;;  %p3227_p6 = por %p3226_p8, %p3225_p5 }
  0x88   : > { %p3228_p12 = pnand %p3227_p6, %p3221_p2 }
  0x8a   : > { %3231 = shalt.err (!%p3228_p12)
}
  0x8b   : > { %2862 = dma.hbm_to_vmem [thread:$0]  (%p3555_p4), %s3638_s29, 192, %s3640_s5, %s3609_s4, %s3363_s9, %s3363_s9, %s3364_s10  }
  0x8c PF: > { %p2621_p10 = scmp.ge.s32.totalorder %s3357_s22, 1  ;;  %p399_p11 = scmp.lt.s32.totalorder %s3357_s22, 9 }
  0x8e   : > { %p400_p0 = pnand %p2621_p10, %p399_p11 }
  0x8f   : > { %s405_s19 = sand.u32 (!%p400_p0), 1, %s3333_s16   ;;  %p4724_p1 = scmp.ne.s32.totalorder (!%p400_p0), %s4715_s15, 0 }
  0x90   : > { %403 = sbr.rel (%p400_p0) target bundleno = 1602 (0x642), region = 56  ;;  %s406_s23 = scalar_lea.sflag (!%p400_p0), [#allocation3], %s405_s19 }
  0x91   : > { %s2858_s24 = smul.u32 (!%p400_p0), 48, %s405_s19 }
  0x93   : > { %s3670_s3 = scalar_lea.vmem (!%p400_p0), [#allocation2], %s2858_s24 }
  0x97   : > { %3290 = dma.done.wait (%p4724_p1), %s406_s23, 768  }
  0x98   : > { %3292 = vsyncadd (%p4724_p1), %s406_s23, 4294966528  ;;  %s4725_s4 = sadd.s32 4294967295, %s3357_s22   ;;  %s416_s10 = sand.u32 1, %s3321_s13  }
  0x99   : > { %s414_s9 = sand.u32 1, %s4725_s4   ;;  %s2859_s29 = smul.u32 12, %s416_s10 }
  0x9a   : > { %s415_s5 = scalar_lea.sflag [#allocation5], %s414_s9  ;;  %p4726_p4 = scmp.ne.s32.totalorder %s4719_s7, 0 }
  0x9b   : > { %s3679_s8 = scalar_lea.vmem [#allocation4], %s2859_s29 }
  0x9c   : > { %3294 = dma.done.wait (%p4726_p4), %s415_s5, 192  }
  0x9d   : > { %3296 = vsyncadd (%p4726_p4), %s415_s5, 4294967104  ;;  %s4727_s27 = sld [smem:[#allocation10_spill]]  ;;  %s4728_s30 = sld [smem:[#allocation19_spill]] }
  0xa3   : > { %s425_s26 = sand.u32 1, %s4727_s27   ;;  %p4729_p3 = scmp.ne.s32.totalorder %s4728_s30, 0 }
  0xa4   : > { %s3686_s15 = smul.u32 12, %s425_s26 }
  0xa6   : > { %s427_s18 = scalar_lea.vmem [#allocation6], %s3686_s15 }
  0xa7   : > { %3298 = dma.done.wait (%p4729_p3), %s415_s5, 192  }
  0xa8   : > { %3300 = vsyncadd (%p4729_p3), %s415_s5, 4294967104  ;;  %v3366_v0 = vmov 0.0   ;;  %vm3367_vm0 = vmmov 0   ;;  %s4730_s17 = sld [smem:[#allocation20_spill]]  ;;  %v3704_v3 = vld [vmem:[%s3670_s3 + $0xc] sm:$0xf] }
  0xa9   : > { %2741 = vmatprep.subr.bf16.mxu0 %v3366_v0  ;;  %2749 = vmatprep.mubr.msk.bf16.mxu0 %vm3367_vm0, %v3366_v0  ;;  %vm2317_vm1 = vsmask.f32 3328  ;;  %v2321_v4 = vshrl.u32 %v3704_v3, 16  ;;  %v2324_v5 = vshll.u32 %v3704_v3, 16  ;;  %v3709_v6 = vld [vmem:[%s3670_s3 + $0x10] sm:$0xf]  ;;  %v728_v55 = vunpack.c.l.bf16 %v3704_v3 }
  0xaa   : > { %v3712_v7 = vld [vmem:[%s3670_s3 + $0x14] sm:$0xf]  ;;  %vm592_vm2 = vcmask 523264   ;;  %v2330_v9 = vshll.u32 %v3709_v6, 16  ;;  %v2334_v10 = vshrl.u32 %v3709_v6, 16  ;;  %v3732_v20 = vld [vmem:[%s3670_s3] sm:$0xff]   ;;  %v729_v51 = vunpack.c.l.bf16 %v3709_v6 }
  0xab   : > { %v2340_v11 = vshll.u32 %v3712_v7, 16  ;;  %v3721_v12 = vld [vmem:[%s3670_s3 + $0x18] sm:$0xf]  ;;  %v2323_v13 = vrot.slane %v2321_v4, 4  ;;  %v2326_v14 = vrot.slane %v2324_v5, 5  ;;  %v730_v58 = vunpack.c.l.bf16 %v3712_v7  ;;  %s4734_s10 = sld [smem:[#allocation23_spill]] }
  0xac   : > { %v2345_v15 = vshrl.u32 %v3721_v12, 16  ;;  %v2348_v16 = vshll.u32 %v3721_v12, 16  ;;  %vm2318_vm3 = vsmask.f32 7440  ;;  %v3726_v17 = vrot.slane %v2330_v9, 5  ;;  %s4735_s27 = sld [smem:[#allocation21_spill]] }
  0xad   : > { %v2336_v18 = vrot.slane %v2334_v10, 4  ;;  %v3729_v19 = vld [vmem:[%s3670_s3 + $0x1c] sm:$0xf]  ;;  %v2327_v21 = vor.u32 %v2326_v14, %v2323_v13  ;;  %v3736_v25 = vld [vmem:[%s3670_s3 + $0x20] sm:$0xf]  ;;  %v3742_v28 = vrot.slane %v2340_v11, 5  ;;  %vm3758_vm4 = vmor %vm2317_vm1, %vm2318_vm3  ;;  %v747_v57 = vmul.f32 %v729_v51, %v729_v51 }
  0xae   : > { %s4731_s25 = smov %s4730_s17  ;;  %v2986_v1 = vld [vmem:[%s4730_s17] sm:$0xff]   ;;  %v2347_v22 = vrot.slane %v2345_v15, 4  ;;  %v2350_v23 = vrot.slane %v2348_v16, 5  ;;  %v2354_v24 = vshll.u32 %v3729_v19, 16  ;;  %v2358_v29 = vshrl.u32 %v3729_v19, 16  ;;  %s3368_s15 = smov 32  }
  0xaf   : > { %2742 = vmatpush3.bf16.msra.mxu0 %v2986_v1  ;;  %v2987_v2 = vld [vmem:[%s4731_s25 + $0x8] sm:$0xff]   ;;  %v2988_v8 = vld [vmem:[%s4731_s25 + $0x10] sm:$0xff]   ;;  %v2989_v26 = vld [vmem:[%s4731_s25 + $0x18] sm:$0xff]   ;;  %v2337_v27 = vor.u32 %v2336_v18, %v3726_v17  ;;  %v2364_v31 = vshll.u32 %v3736_v25, 16  ;;  %v3750_v32 = vrot.slane %v2327_v21, 4  ;;  %v746_v62 = vmul.f32 %v728_v55, %v728_v55  ;;  %s3369_s28 = smov 16  }
  0xb0   : > { %2743 = vmatprep.subr.bf16.mxu0 %v3366_v0  ;;  %v3746_v30 = vld [vmem:[%s3670_s3 + $0x24] sm:$0xf]  ;;  %v2351_v33 = vor.u32 %v2350_v23, %v2347_v22  ;;  %v3752_v34 = vrot.slane %v2354_v24, 5  ;;  %v499_v36 = vld [vmem:[%s3670_s3 + $0x8] sm:$0xf]  ;;  %v2360_v39 = vrot.slane %v2358_v29, 4  ;;  %v748_v4 = vmul.f32 %v730_v58, %v730_v58 }
  0xb1   : > { %v2369_v35 = vshrl.u32 %v3746_v30, 16  ;;  %v3762_v38 = vrot.slane %v2337_v27, 4  ;;  %v2372_v40 = vshll.u32 %v3746_v30, 16  ;;  %v2333_v41 = vsel %vm3758_vm4, %v3750_v32, %v3726_v17  ;;  %v3784_v52 = vld [vmem:[%s3670_s3 + $0x28] sm:$0xf]  ;;  %s4739_s17 = sld [smem:[#allocation13_spill]] }
  0xb2   : > { %v3769_v42 = vrot.slane %v2351_v33, 4  ;;  %v727_v44 = vunpack.c.l.bf16 %v499_v36  ;;  %v2361_v46 = vor.u32 %v2360_v39, %v3752_v34  ;;  %v3776_v47 = vrot.slane %v2364_v31, 5  ;;  %v3794_v59 = vld [vmem:[%s3670_s3 + $0x2c] sm:$0xf]  ;;  %s4740_s4 = sld [smem:[#allocation25_spill]]  ;;  %s4741_s29 = sld [smem:[#allocation26_spill]] }
  0xb3   : > { %2744 = vmatpush3.bf16.msra.mxu0 %v2987_v2  ;;  %v2371_v43 = vrot.slane %v2369_v35, 4  ;;  %v2343_v45 = vsel %vm3758_vm4, %v3762_v38, %v3742_v28  ;;  %v2374_v48 = vrot.slane %v2372_v40, 5  ;;  %v2378_v63 = vshll.u32 %v3784_v52, 16  ;;  %v3830_v35 = vld [vmem:[%s3679_s8 + $0x4] sm:$0xf] }
  0xb4   : > { %2745 = vmatprep.subr.bf16.mxu0 %v3366_v0  ;;  %v2357_v49 = vsel %vm3758_vm4, %v3769_v42, %v3752_v34  ;;  %v745_v50 = vmul.f32 %v727_v44, %v727_v44  ;;  %v3786_v53 = vrot.slane %v2361_v46, 4  ;;  %v2626_v1 = vcombine.low %v499_v36, %v3704_v3  ;;  %v3842_v44 = vld [vmem:[%s3679_s8] sm:$0xf] }
  0xb5   : > { %v2375_v54 = vor.u32 %v2374_v48, %v2371_v43  ;;  %v773_v2 = vsel %vm592_vm2, %v747_v57, 0.0  ;;  %v2382_v5 = vshrl.u32 %v3784_v52, 16  ;;  %v3809_v9 = vrot.slane %v2378_v63, 5  ;;  %v511_v63 = vld [vmem:[%s3679_s8 + $0x8] sm:$0xf] }
  0xb6   : > { %v767_v56 = vsel %vm592_vm2, %v745_v50, 0.0  ;;  %v2367_v60 = vsel %vm3758_vm4, %v3786_v53, %v3776_v47  ;;  %774 = vadd.xlane.f32.xlu1 %v773_v2  ;;  %v2388_v10 = vshll.u32 %v3794_v59, 16  ;;  %v731_v11 = vunpack.c.l.bf16 %v3721_v12 }
  0xb7   : > { %2746 = vmatpush3.bf16.msra.mxu0 %v2988_v8  ;;  %v3802_v61 = vrot.slane %v2375_v54, 4  ;;  %768 = vadd.xlane.f32.xlu0 %v767_v56  ;;  %v770_v8 = vsel %vm592_vm2, %v746_v62, 0.0  ;;  %v776_v13 = vsel %vm592_vm2, %v748_v4, 0.0  ;;  %v2384_v14 = vrot.slane %v2382_v5, 4  ;;  %p487_p9 = scmp.lt.s32.totalorder %s4739_s17, 1 }
  0xb8   : > { %2747 = vmatprep.subr.bf16.mxu0 %v3366_v0  ;;  %v732_v15 = vunpack.c.l.bf16 %v3729_v19  ;;  %v733_v3 = vunpack.c.l.bf16 %v3736_v25  ;;  %v749_v18 = vmul.f32 %v731_v11, %v731_v11  ;;  %v734_v21 = vunpack.c.l.bf16 %v3746_v30 }
  0xb9   : > { %v2385_v22 = vor.u32 %v2384_v14, %v3809_v9  ;;  %v3822_v23 = vrot.slane %v2388_v10, 5  ;;  %v2402_v36 = vshll.u32 %v3830_v35, 16  ;;  %v2406_v39 = vshrl.u32 %v3830_v35, 16  ;;  %s4773_s17 = smov (!%p487_p9, %s4739_s17), 1 }
  0xba   : > { %v750_v24 = vmul.f32 %v732_v15, %v732_v15  ;;  %777 = vadd.xlane.f32.xlu1 %v776_v13  ;;  %v779_v27 = vsel %vm592_vm2, %v749_v18, 0.0  ;;  %v752_v33 = vmul.f32 %v734_v21, %v734_v21  ;;  %v735_v46 = vunpack.c.l.bf16 %v3784_v52  ;;  %v512_v21 = vld [vmem:[%s427_s18] sm:$0xf]  ;;  %s2623_s12 = sshll.u32 %s4773_s17, 5 }
  0xbb   : > { %2748 = vmatpush3.bf16.msra.mxu0 %v2989_v26  ;;  %771 = vadd.xlane.f32.xlu0 %v770_v8  ;;  %v751_v26 = vmul.f32 %v733_v3, %v733_v3  ;;  %v3826_v29 = vrot.slane %v2385_v22, 4  ;;  %v736_v48 = vunpack.c.l.bf16 %v3794_v59  ;;  %v2627_v50 = vcombine.low %v3709_v6, %v3712_v7 }
  0xbc   : > { %v782_v31 = vsel %vm592_vm2, %v750_v24, 0.0  ;;  %v3848_v51 = vrot.slane %v2402_v36, 5  ;;  %v2408_v54 = vrot.slane %v2406_v39, 4  ;;  %v737_v55 = vunpack.c.l.bf16 %v3842_v44 }
  0xbd   : > { %v785_v43 = vsel %vm592_vm2, %v751_v26, 0.0  ;;  %v788_v56 = vsel %vm592_vm2, %v752_v33, 0.0  ;;  %v753_v57 = vmul.f32 %v735_v46, %v735_v46  ;;  %v754_v58 = vmul.f32 %v736_v48, %v736_v48 }
  0xbe   : > { %2750 = vmatmul.mubr.msk.bf16.vlgmr.msra.gmra.mrb[0].mxu0 %vm592_vm2, %v3732_v20  ;;  %783 = vadd.xlane.f32.xlu1 %v782_v31  ;;  %v738_v62 = vunpack.c.l.bf16 %v3830_v35  ;;  %v2412_v2 = vshll.u32 %v511_v63, 16  ;;  %v755_v6 = vmul.f32 %v737_v55, %v737_v55  ;;  %v739_v8 = vunpack.c.l.bf16 %v511_v63  ;;  %v513_v31 = vld [vmem:[%s427_s18 + $0x4] sm:$0xff]  }
  0xbf   : > { %2753 = vmatprep.mubr.msk.bf16.mxu0 %vm3367_vm0, %v3366_v0  ;;  %780 = vadd.xlane.f32.xlu0 %v779_v27  ;;  %v791_v4 = vsel %vm592_vm2, %v753_v57, 0.0  ;;  %v794_v10 = vsel %vm592_vm2, %v754_v58, 0.0  ;;  %v725_v13 = vunpack.c.l.bf16 %v3732_v20  ;;  %v726_v18 = vunpack.c.h.bf16 %v3732_v20 }
  0xc0   : > { %v3858_v5 = vrot.slane %v2412_v2, 5  ;;  %v756_v11 = vmul.f32 %v738_v62, %v738_v62  ;;  %v797_v15 = vsel %vm592_vm2, %v755_v6, 0.0  ;;  %v757_v3 = vmul.f32 %v739_v8, %v739_v8 }
  0xc1   : > { %v2628_v22 = vcombine.low %v3721_v12, %v3729_v19  ;;  %v743_v26 = vmul.f32 %v725_v13, %v725_v13  ;;  %v740_v27 = vunpack.c.l.bf16 %v512_v21  ;;  %v744_v36 = vmul.f32 %v726_v18, %v726_v18 }
  0xc2   : > { %789 = vadd.xlane.f32.xlu1 %v788_v56  ;;  %v800_v24 = vsel %vm592_vm2, %v756_v11, 0.0  ;;  %v803_v33 = vsel %vm592_vm2, %v757_v3, 0.0  ;;  %v741_v39 = vunpack.c.l.bf16 %v513_v31  ;;  %v742_v46 = vunpack.c.h.bf16 %v513_v31 }
  0xc3   : > { %786 = vadd.xlane.f32.xlu0 %v785_v43  ;;  %v761_v20 = vsel %vm592_vm2, %v743_v26, 0.0  ;;  %v758_v43 = vmul.f32 %v740_v27, %v740_v27  ;;  %v764_v12 = vsel %vm592_vm2, %v744_v36, 0.0  ;;  %v2629_v48 = vcombine.low %v3736_v25, %v3746_v30 }
  0xc4   : > { %v759_v19 = vmul.f32 %v741_v39, %v741_v39  ;;  %v2630_v57 = vcombine.low %v3784_v52, %v3794_v59  ;;  %v2631_v25 = vcombine.low %v3842_v44, %v3830_v35  ;;  %v2632_v30 = vcombine.low %v511_v63, %v512_v21 }
  0xc5   : > { %vm924_vm5 = vcmask 130048   ;;  %vm1370_vm6 = vcmask 1046528   ;;  %vm1285_vm7 = vsmask.f32 7424  ;;  %vm1413_vm8 = vcmask 261120  }
  0xc6   : > { %2754 = vmatmul.mubr.msk.bf16.gmra.mrb[4].mxu0 %vm592_vm2, %v2626_v1  ;;  %v2409_v1 = vor.u32 %v2408_v54, %v3848_v51  ;;  %795 = vadd.xlane.f32.xlu1 %v794_v10  ;;  %v760_v54 = vmul.f32 %v742_v46, %v742_v46  ;;  %v809_v55 = vsel %vm592_vm2, %v759_v19, 0.0  ;;  %vm1454_vm9 = vcmask 392192  }
  0xc7   : > { %2757 = vmatprep.mubr.msk.bf16.mxu0 %vm3367_vm0, %v3366_v0  ;;  %792 = vadd.xlane.f32.xlu0 %v791_v4  ;;  %v2427_v17 = vunpack.c.l.bf16 %v2367_v60 }
  0xc8   : > { %v3856_v7 = vrot.slane %v2409_v1, 4  ;;  %v812_v56 = vsel %vm592_vm2, %v760_v54, 0.0 }
  0xca   : > { %801 = vadd.xlane.f32.xlu1 %v800_v24 }
  0xcb   : > { %798 = vadd.xlane.f32.xlu0 %v797_v15 }
  0xce   : > { %2758 = vmatmul.mubr.msk.bf16.gmra.mrb[8].mxu0 %vm592_vm2, %v2627_v50  ;;  %762 = vadd.xlane.f32.xlu1 %v761_v20  ;;  %v806_v50 = vsel %vm592_vm2, %v758_v43, 0.0 }
  0xcf   : > { %2761 = vmatprep.mubr.msk.bf16.mxu0 %vm3367_vm0, %v3366_v0  ;;  %804 = vadd.xlane.f32.xlu0 %v803_v33 }
  0xd2   : > { %807 = vadd.xlane.f32.xlu1 %v806_v50 }
  0xd3   : > { %765 = vadd.xlane.f32.xlu0 %v764_v12 }
  0xd6   : > { %2762 = vmatmul.mubr.msk.bf16.gmra.mrb[12].mxu0 %vm592_vm2, %v2628_v22  ;;  %813 = vadd.xlane.f32.xlu1 %v812_v56 }
  0xd7   : > { %2765 = vmatprep.mubr.msk.bf16.mxu0 %vm3367_vm0, %v3366_v0  ;;  %810 = vadd.xlane.f32.xlu0 %v809_v55 }
  0xde   : > { %2766 = vmatmul.mubr.msk.bf16.gmra.mrb[16].mxu0 %vm592_vm2, %v2629_v48 }
  0xdf   : > { %2769 = vmatprep.mubr.msk.bf16.mxu0 %vm3367_vm0, %v3366_v0 }
  0xe6   : > { %2770 = vmatmul.mubr.msk.bf16.gmra.mrb[20].mxu0 %vm592_vm2, %v2630_v57 }
  0xe7   : > { %2773 = vmatprep.mubr.msk.bf16.mxu0 %vm3367_vm0, %v3366_v0 }
  0xee   : > { %2774 = vmatmul.mubr.msk.bf16.gmra.mrb[24].mxu0 %vm592_vm2, %v2631_v25 }
  0xef   : > { %2777 = vmatprep.mubr.msk.bf16.mxu0 %vm3367_vm0, %v3366_v0 }
  0xf6   : > { %2778 = vmatmul.mubr.msk.bf16.gmra.mrb[28].mxu0 %vm592_vm2, %v2632_v30 }
  0xf7   : > { %2781 = vmatprep.mubr.msk.bf16.mxu0 %vm3367_vm0, %v3366_v0 }
  0xfe   : > { %2782 = vmatmul.mubr.msk.bf16.gmra.mrb[32].mxu0 %vm592_vm2, %v513_v31 }
 0x143   : > { %v775_v1 = vpop.xlane.xlu1 %774 }
 0x144   : > { %v769_v52 = vpop.xlane.xlu0 %768  ;;  %v856_v44 = vadd.f32 1e-06, %v775_v1 }
 0x145   : > { %v854_v59 = vadd.f32 1e-06, %v769_v52 }
 0x147   : > { %3010 = vrsqrt.f32 %v854_v59  ;;  %v778_v2 = vpop.xlane.xlu1 %777 }
 0x148   : > { %v772_v58 = vpop.xlane.xlu0 %771  ;;  %v857_v63 = vadd.f32 1e-06, %v778_v2 }
 0x149   : > { %v855_v62 = vadd.f32 1e-06, %v772_v58 }
 0x14b   : > { %3012 = vrsqrt.f32 %v855_v62  ;;  %v784_v3 = vpop.xlane.xlu1 %783 }
 0x14c   : > { %3014 = vrsqrt.f32 %v856_v44  ;;  %v781_v10 = vpop.xlane.xlu0 %780  ;;  %v859_v22 = vadd.f32 1e-06, %v784_v3 }
 0x14d   : > { %3016 = vrsqrt.f32 %v857_v63  ;;  %v858_v13 = vadd.f32 1e-06, %v781_v10 }
 0x14f   : > { %3018 = vrsqrt.f32 %v858_v13  ;;  %v790_v56 = vpop.xlane.xlu1 %789 }
 0x150   : > { %v787_v39 = vpop.xlane.xlu0 %786  ;;  %3020 = vrsqrt.f32 %v859_v22  ;;  %v861_v58 = vadd.f32 1e-06, %v790_v56 }
 0x151   : > { %v3011_v0 = vpop.eup %3010  ;;  %v860_v46 = vadd.f32 1e-06, %v787_v39 }
 0x152   : > { %v890_v26 = vmul.f32 12.5, %v3011_v0 }
 0x153   : > { %3022 = vrsqrt.f32 %v860_v46 }
 0x154   : > { %3024 = vrsqrt.f32 %v861_v58 }
 0x155   : > { %v3013_v11 = vpop.eup %3012 }
 0x156   : > { %v891_v27 = vmul.f32 12.5, %v3013_v11  ;;  %v3015_v12 = vpop.eup %3014 }
 0x157   : > { %v3017_v54 = vpop.eup %3016  ;;  %v892_v59 = vmul.f32 12.5, %v3015_v12 }
 0x158   : > { %v893_v1 = vmul.f32 12.5, %v3017_v54 }
 0x159   : > { %v3019_v13 = vpop.eup %3018 }
 0x191   : > { %v3906_v35 = vpop.f32.mrb[0].mxu0 }
 0x192   : > { %v2751_v4 = vpop.f32.mrb[1].mxu0 }
 0x193   : > { %v3908_v6 = vpop.f32.mrb[2].mxu0 }
 0x194   : > { %v2752_v8 = vpop.f32.mrb[3].mxu0 }
 0x195   : > { %v793_v8 = vpop.xlane.xlu0 %792 }
 0x196   : > { %v862_v22 = vadd.f32 1e-06, %v793_v8 }
 0x198   : > { %3026 = vrsqrt.f32 %v862_v22 }
 0x199   : > { %v662_v15 = vpop.f32.mrb[4].mxu0 }
 0x19a   : > { %v818_v18 = vand.u32 2147483647, %v662_v15  ;;  %v2755_v21 = vpop.f32.mrb[5].mxu0 }
 0x19b   : > { %v665_v24 = vpop.f32.mrb[6].mxu0  ;;  %v3021_v21 = vpop.eup %3020 }
 0x19c   : > { %v836_v31 = vmul.f32 %v818_v18, %v662_v15  ;;  %v819_v33 = vand.u32 2147483647, %v665_v24  ;;  %v2756_v36 = vpop.f32.mrb[7].mxu0  ;;  %v895_v12 = vmul.f32 12.5, %v3021_v21 }
 0x19e   : > { %v3910_v20 = vmul.f32 %v890_v26, %v836_v31  ;;  %v837_v43 = vmul.f32 %v819_v33, %v665_v24  ;;  %v894_v26 = vmul.f32 12.5, %v3019_v13 }
 0x1a0   : > { %v3912_v19 = vmul.f32 %v891_v27, %v837_v43  ;;  %v931_v48 = vsel %vm924_vm5, %v3910_v20, 0.0  ;;  %v981_v50 = vmul.f32 %v3910_v20, %v3910_v20  ;;  %v796_v27 = vpop.xlane.xlu1 %795 }
 0x1a1   : > { %932 = vadd.xlane.f32.xlu0 %v931_v48  ;;  %v670_v55 = vpop.f32.mrb[8].mxu0  ;;  %v863_v43 = vadd.f32 1e-06, %v796_v27  ;;  %v799_v48 = vpop.xlane.xlu0 %798 }
 0x1a2   : > { %v820_v57 = vand.u32 2147483647, %v670_v55  ;;  %v2759_v25 = vpop.f32.mrb[9].mxu0  ;;  %v934_v30 = vsel %vm924_vm5, %v3912_v19, 0.0  ;;  %v982_v52 = vmul.f32 %v3912_v19, %v3912_v19  ;;  %v1003_v63 = vsel %vm924_vm5, %v981_v50, 0.0 }
 0x1a3   : > { %935 = vadd.xlane.f32.xlu1 %v934_v30  ;;  %v673_v62 = vpop.f32.mrb[10].mxu0  ;;  %3028 = vrsqrt.f32 %v863_v43 }
 0x1a4   : > { %v838_v44 = vmul.f32 %v820_v57, %v670_v55  ;;  %v821_v2 = vand.u32 2147483647, %v673_v62  ;;  %v2760_v4 = vpop.f32.mrb[11].mxu0  ;;  %v1006_v11 = vsel %vm924_vm5, %v982_v52, 0.0  ;;  %v3023_v57 = vpop.eup %3022 }
 0x1a5   : > { %1004 = vadd.xlane.f32.xlu0 %v1003_v63  ;;  %v805_v63 = vpop.xlane.xlu0 %804 }
 0x1a6   : > { %v3923_v0 = vmul.f32 %v892_v59, %v838_v44  ;;  %v839_v10 = vmul.f32 %v821_v2, %v673_v62  ;;  %v3025_v62 = vpop.eup %3024  ;;  %v864_v44 = vadd.f32 1e-06, %v799_v48  ;;  %v802_v2 = vpop.xlane.xlu1 %801 }
 0x1a7   : > { %1007 = vadd.xlane.f32.xlu1 %v1006_v11  ;;  %v897_v22 = vmul.f32 12.5, %v3025_v62  ;;  %v3027_v43 = vpop.eup %3026 }
 0x1a8   : > { %v3926_v15 = vmul.f32 %v893_v1, %v839_v10  ;;  %v937_v3 = vsel %vm924_vm5, %v3923_v0, 0.0  ;;  %v983_v18 = vmul.f32 %v3923_v0, %v3923_v0  ;;  %v896_v1 = vmul.f32 12.5, %v3023_v57 }
 0x1a9   : > { %938 = vadd.xlane.f32.xlu0 %v937_v3  ;;  %v678_v24 = vpop.f32.mrb[12].mxu0  ;;  %3030 = vrsqrt.f32 %v864_v44  ;;  %v766_v48 = vpop.xlane.xlu0 %765 }
 0x1aa   : > { %v822_v31 = vand.u32 2147483647, %v678_v24  ;;  %v2763_v33 = vpop.f32.mrb[13].mxu0  ;;  %v940_v36 = vsel %vm924_vm5, %v3926_v15, 0.0  ;;  %v984_v39 = vmul.f32 %v3926_v15, %v3926_v15  ;;  %v1009_v56 = vsel %vm924_vm5, %v983_v18, 0.0 }
 0x1ab   : > { %941 = vadd.xlane.f32.xlu1 %v940_v36  ;;  %v681_v46 = vpop.f32.mrb[14].mxu0  ;;  %v865_v18 = vadd.f32 1e-06, %v802_v2  ;;  %v853_v2 = vadd.f32 1e-06, %v766_v48 }
 0x1ac   : > { %v840_v50 = vmul.f32 %v822_v31, %v678_v24  ;;  %v823_v54 = vand.u32 2147483647, %v681_v46  ;;  %v2764_v55 = vpop.f32.mrb[15].mxu0  ;;  %v1012_v52 = vsel %vm924_vm5, %v984_v39, 0.0 }
 0x1ad   : > { %1010 = vadd.xlane.f32.xlu0 %v1009_v56  ;;  %3032 = vrsqrt.f32 %v865_v18  ;;  %v3029_v56 = vpop.eup %3028 }
 0x1ae   : > { %v3937_v25 = vmul.f32 %v894_v26, %v840_v50  ;;  %v841_v30 = vmul.f32 %v823_v54, %v681_v46  ;;  %v866_v46 = vadd.f32 1e-06, %v805_v63  ;;  %v899_v63 = vmul.f32 12.5, %v3029_v56 }
 0x1af   : > { %1013 = vadd.xlane.f32.xlu1 %v1012_v52 }
 0x1b0   : > { %v3940_v59 = vmul.f32 %v895_v12, %v841_v30  ;;  %v943_v58 = vsel %vm924_vm5, %v3937_v25, 0.0  ;;  %v985_v3 = vmul.f32 %v3937_v25, %v3937_v25  ;;  %v763_v12 = vpop.xlane.xlu1 %762  ;;  %v898_v30 = vmul.f32 12.5, %v3027_v43 }
 0x1b1   : > { %944 = vadd.xlane.f32.xlu0 %v943_v58  ;;  %v686_v4 = vpop.f32.mrb[16].mxu0  ;;  %3034 = vrsqrt.f32 %v866_v46  ;;  %v852_v44 = vadd.f32 1e-06, %v763_v12 }
 0x1b2   : > { %v824_v8 = vand.u32 2147483647, %v686_v4  ;;  %v2767_v10 = vpop.f32.mrb[17].mxu0  ;;  %v946_v11 = vsel %vm924_vm5, %v3940_v59, 0.0  ;;  %v986_v13 = vmul.f32 %v3940_v59, %v3940_v59  ;;  %v1015_v39 = vsel %vm924_vm5, %v985_v3, 0.0 }
 0x1b3   : > { %947 = vadd.xlane.f32.xlu1 %v946_v11  ;;  %v689_v21 = vpop.f32.mrb[18].mxu0  ;;  %3036 = vrsqrt.f32 %v852_v44 }
 0x1b4   : > { %v842_v24 = vmul.f32 %v824_v8, %v686_v4  ;;  %v825_v26 = vand.u32 2147483647, %v689_v21  ;;  %v2768_v27 = vpop.f32.mrb[19].mxu0  ;;  %v1018_v31 = vsel %vm924_vm5, %v986_v13, 0.0  ;;  %v808_v3 = vpop.xlane.xlu1 %807  ;;  %3038 = vrsqrt.f32 %v853_v2 }
 0x1b5   : > { %1019 = vadd.xlane.f32.xlu0 %v1018_v31  ;;  %v867_v46 = vadd.f32 1e-06, %v808_v3 }
 0x1b6   : > { %v3951_v33 = vmul.f32 %v896_v1, %v842_v24  ;;  %v843_v36 = vmul.f32 %v825_v26, %v689_v21  ;;  %v3031_v24 = vpop.eup %3030 }
 0x1b7   : > { %1016 = vadd.xlane.f32.xlu1 %v1015_v39  ;;  %v811_v39 = vpop.xlane.xlu0 %810  ;;  %v3033_v43 = vpop.eup %3032  ;;  %v900_v48 = vmul.f32 12.5, %v3031_v24  ;;  %3040 = vrsqrt.f32 %v867_v46 }
 0x1b8   : > { %v3954_v50 = vmul.f32 %v897_v22, %v843_v36  ;;  %v949_v54 = vsel %vm924_vm5, %v3951_v33, 0.0  ;;  %v987_v55 = vmul.f32 %v3951_v33, %v3951_v33  ;;  %v814_v36 = vpop.xlane.xlu1 %813 }
 0x1b9   : > { %950 = vadd.xlane.f32.xlu0 %v949_v54  ;;  %v694_v57 = vpop.f32.mrb[20].mxu0 }
 0x1ba   : > { %v826_v52 = vand.u32 2147483647, %v694_v57  ;;  %v2771_v58 = vpop.f32.mrb[21].mxu0  ;;  %v952_v62 = vsel %vm924_vm5, %v3954_v50, 0.0  ;;  %v988_v1 = vmul.f32 %v3954_v50, %v3954_v50  ;;  %v1021_v13 = vsel %vm924_vm5, %v987_v55, 0.0 }
 0x1bb   : > { %953 = vadd.xlane.f32.xlu1 %v952_v62  ;;  %v697_v4 = vpop.f32.mrb[22].mxu0  ;;  %v868_v58 = vadd.f32 1e-06, %v811_v39  ;;  %v901_v62 = vmul.f32 12.5, %v3033_v43 }
 0x1bc   : > { %v844_v8 = vmul.f32 %v826_v52, %v694_v57  ;;  %v827_v10 = vand.u32 2147483647, %v697_v4  ;;  %v2772_v11 = vpop.f32.mrb[23].mxu0  ;;  %v1024_v22 = vsel %vm924_vm5, %v988_v1, 0.0  ;;  %v869_v52 = vadd.f32 1e-06, %v814_v36 }
 0x1bd   : > { %1022 = vadd.xlane.f32.xlu0 %v1021_v13  ;;  %3042 = vrsqrt.f32 %v868_v58  ;;  %v816_v13 = vand.u32 2147483647, %v3906_v35 }
 0x1be   : > { %v3965_v18 = vmul.f32 %v898_v30, %v844_v8  ;;  %v845_v21 = vmul.f32 %v827_v10, %v697_v4  ;;  %3044 = vrsqrt.f32 %v869_v52 }
 0x1bf   : > { %1025 = vadd.xlane.f32.xlu1 %v1024_v22 }
 0x1c0   : > { %v3968_v26 = vmul.f32 %v899_v63, %v845_v21  ;;  %v955_v27 = vsel %vm924_vm5, %v3965_v18, 0.0  ;;  %v989_v31 = vmul.f32 %v3965_v18, %v3965_v18  ;;  %v3035_v63 = vpop.eup %3034 }
 0x1c1   : > { %956 = vadd.xlane.f32.xlu0 %v955_v27  ;;  %v702_v12 = vpop.f32.mrb[24].mxu0  ;;  %v3037_v22 = vpop.eup %3036  ;;  %v902_v24 = vmul.f32 12.5, %v3035_v63  ;;  %v817_v27 = vand.u32 2147483647, %v3908_v6 }
 0x1c2   : > { %v828_v54 = vand.u32 2147483647, %v702_v12  ;;  %v2775_v55 = vpop.f32.mrb[25].mxu0  ;;  %v958_v56 = vsel %vm924_vm5, %v3968_v26, 0.0  ;;  %v990_v57 = vmul.f32 %v3968_v26, %v3968_v26  ;;  %v1027_v4 = vsel %vm924_vm5, %v989_v31, 0.0  ;;  %v3039_v36 = vpop.eup %3038 }
 0x1c3   : > { %959 = vadd.xlane.f32.xlu1 %v958_v56  ;;  %v705_v30 = vpop.f32.mrb[26].mxu0  ;;  %v888_v55 = vmul.f32 12.5, %v3037_v22  ;;  %v834_v56 = vmul.f32 %v816_v13, %v3906_v35  ;;  %v889_v58 = vmul.f32 12.5, %v3039_v36 }
 0x1c4   : > { %v846_v1 = vmul.f32 %v828_v54, %v702_v12  ;;  %v829_v44 = vand.u32 2147483647, %v705_v30  ;;  %v2776_v2 = vpop.f32.mrb[27].mxu0  ;;  %v1030_v11 = vsel %vm924_vm5, %v990_v57, 0.0 }
 0x1c5   : > { %1028 = vadd.xlane.f32.xlu0 %v1027_v4  ;;  %v3041_v4 = vpop.eup %3040  ;;  %v4000_v63 = vmul.f32 %v888_v55, %v834_v56 }
 0x1c6   : > { %v3979_v8 = vmul.f32 %v900_v48, %v846_v1  ;;  %v847_v10 = vmul.f32 %v829_v44, %v705_v30  ;;  %v903_v22 = vmul.f32 12.5, %v3041_v4 }
 0x1c7   : > { %1031 = vadd.xlane.f32.xlu1 %v1030_v11  ;;  %v3043_v11 = vpop.eup %3042 }
 0x1c8   : > { %v3983_v3 = vmul.f32 %v901_v62, %v847_v10  ;;  %v961_v21 = vsel %vm924_vm5, %v3979_v8, 0.0  ;;  %v991_v48 = vmul.f32 %v3979_v8, %v3979_v8  ;;  %v835_v62 = vmul.f32 %v817_v27, %v3908_v6 }
 0x1c9   : > { %962 = vadd.xlane.f32.xlu0 %v961_v21  ;;  %v710_v31 = vpop.f32.mrb[28].mxu0  ;;  %v3045_v21 = vpop.eup %3044  ;;  %v904_v56 = vmul.f32 12.5, %v3043_v11 }
 0x1ca   : > { %v830_v39 = vand.u32 2147483647, %v710_v31  ;;  %v2779_v43 = vpop.f32.mrb[29].mxu0  ;;  %v964_v46 = vsel %vm924_vm5, %v3983_v3, 0.0  ;;  %v992_v12 = vmul.f32 %v3983_v3, %v3983_v3  ;;  %v1033_v2 = vsel %vm924_vm5, %v991_v48, 0.0 }
 0x1cb   : > { %965 = vadd.xlane.f32.xlu1 %v964_v46  ;;  %v713_v54 = vpop.f32.mrb[30].mxu0  ;;  %v4006_v13 = vmul.f32 %v889_v58, %v835_v62  ;;  %v925_v43 = vsel %vm924_vm5, %v4000_v63, 0.0  ;;  %v979_v46 = vmul.f32 %v4000_v63, %v4000_v63  ;;  %v905_v55 = vmul.f32 12.5, %v3045_v21 }
 0x1cc   : > { %v848_v57 = vmul.f32 %v830_v39, %v710_v31  ;;  %v2780_v30 = vpop.f32.mrb[31].mxu0  ;;  %v1036_v52 = vsel %vm924_vm5, %v992_v12, 0.0  ;;  %v831_v44 = vand.u32 2147483647, %v713_v54 }
 0x1cd   : > { %1037 = vadd.xlane.f32.xlu0 %v1036_v52  ;;  %v980_v58 = vmul.f32 %v4006_v13, %v4006_v13  ;;  %v997_v62 = vsel %vm924_vm5, %v979_v46, 0.0 }
 0x1ce   : > { %v3997_v1 = vmul.f32 %v902_v24, %v848_v57  ;;  %v849_v24 = vmul.f32 %v831_v44, %v713_v54  ;;  %v928_v54 = vsel %vm924_vm5, %v4006_v13, 0.0 }
 0x1cf   : > { %1034 = vadd.xlane.f32.xlu1 %v1033_v2  ;;  %v1000_v4 = vsel %vm924_vm5, %v980_v58, 0.0 }
 0x1d0   : > { %v967_v35 = vsel %vm924_vm5, %v3997_v1, 0.0  ;;  %v993_v10 = vmul.f32 %v3997_v1, %v3997_v1  ;;  %v4015_v57 = vmul.f32 %v903_v22, %v849_v24 }
 0x1d1   : > { %968 = vadd.xlane.f32.xlu0 %v967_v35  ;;  %v718_v6 = vpop.f32.mrb[32].mxu0 }
 0x1d2   : > { %v1039_v27 = vsel %vm924_vm5, %v993_v10, 0.0  ;;  %v832_v31 = vand.u32 2147483647, %v718_v6  ;;  %v2783_v36 = vpop.f32.mrb[33].mxu0  ;;  %v994_v35 = vmul.f32 %v4015_v57, %v4015_v57  ;;  %v970_v10 = vsel %vm924_vm5, %v4015_v57, 0.0 }
 0x1d3   : > { %1040 = vadd.xlane.f32.xlu1 %v1039_v27  ;;  %v721_v39 = vpop.f32.mrb[34].mxu0 }
 0x1d4   : > { %v833_v12 = vand.u32 2147483647, %v721_v39  ;;  %v2784_v48 = vpop.f32.mrb[35].mxu0  ;;  %v850_v30 = vmul.f32 %v832_v31, %v718_v6  ;;  %v1042_v11 = vsel %vm924_vm5, %v994_v35, 0.0 }
 0x1d5   : > { %926 = vadd.xlane.f32.xlu0 %v925_v43 }
 0x1d6   : > { %v851_v52 = vmul.f32 %v833_v12, %v721_v39  ;;  %v4020_v44 = vmul.f32 %v904_v56, %v850_v30 }
 0x1d7   : > { %929 = vadd.xlane.f32.xlu1 %v928_v54 }
 0x1d8   : > { %v4022_v2 = vmul.f32 %v905_v55, %v851_v52  ;;  %v995_v21 = vmul.f32 %v4020_v44, %v4020_v44  ;;  %v973_v22 = vsel %vm924_vm5, %v4020_v44, 0.0 }
 0x1d9   : > { %998 = vadd.xlane.f32.xlu0 %v997_v62 }
 0x1da   : > { %v976_v6 = vsel %vm924_vm5, %v4022_v2, 0.0  ;;  %v996_v24 = vmul.f32 %v4022_v2, %v4022_v2  ;;  %v1045_v27 = vsel %vm924_vm5, %v995_v21, 0.0 }
 0x1db   : > { %1001 = vadd.xlane.f32.xlu1 %v1000_v4 }
 0x1dc   : > { %v1048_v31 = vsel %vm924_vm5, %v996_v24, 0.0 }
 0x1dd   : > { %971 = vadd.xlane.f32.xlu0 %v970_v10 }
 0x1df   : > { %1043 = vadd.xlane.f32.xlu1 %v1042_v11 }
 0x1e1   : > { %977 = vadd.xlane.f32.xlu0 %v976_v6 }
 0x1e3   : > { %974 = vadd.xlane.f32.xlu1 %v973_v22 }
 0x1e5   : > { %1046 = vadd.xlane.f32.xlu0 %v1045_v27 }
 0x1e7   : > { %1049 = vadd.xlane.f32.xlu1 %v1048_v31 }
 0x22e   : > { %v933_v36 = vpop.xlane.xlu0 %932 }
 0x22f   : > { %v4040_v39 = vmul.f32 0.0625, %v933_v36 }
 0x230   : > { %v936_v43 = vpop.xlane.xlu1 %935 }
 0x231   : > { %v1054_v46 = vmul.f32 0.0625, %v936_v43  ;;  %v1089_v48 = vmul.f32 %v4040_v39, %v4040_v39 }
 0x232   : > { %v1005_v12 = vpop.xlane.xlu0 %1004 }
 0x233   : > { %v1071_v55 = vmul.f32 0.0625, %v1005_v12  ;;  %v1090_v54 = vmul.f32 %v1054_v46, %v1054_v46 }
 0x234   : > { %v1008_v56 = vpop.xlane.xlu1 %1007 }
 0x235   : > { %v1107_v30 = vsub.f32 %v1071_v55, %v1089_v48  ;;  %v1072_v52 = vmul.f32 0.0625, %v1008_v56 }
 0x236   : > { %v939_v58 = vpop.xlane.xlu0 %938 }
 0x237   : > { %v1125_v62 = vmax.f32 %v1107_v30, 0.0  ;;  %v1108_v4 = vsub.f32 %v1072_v52, %v1090_v54  ;;  %v4044_v35 = vmul.f32 0.0625, %v939_v58 }
 0x238   : > { %v942_v10 = vpop.xlane.xlu1 %941 }
 0x239   : > { %v1126_v11 = vmax.f32 %v1108_v4, 0.0  ;;  %v4046_v6 = vmul.f32 0.0625, %v942_v10  ;;  %v1161_v22 = vadd.f32 1e-05, %v1125_v62  ;;  %v1091_v27 = vmul.f32 %v4044_v35, %v4044_v35 }
 0x23a   : > { %v1011_v21 = vpop.xlane.xlu0 %1010 }
 0x23b   : > { %v1162_v24 = vadd.f32 1e-05, %v1126_v11  ;;  %v1073_v31 = vmul.f32 0.0625, %v1011_v21  ;;  %v1092_v43 = vmul.f32 %v4046_v6, %v4046_v6 }
 0x23c   : > { %v1014_v36 = vpop.xlane.xlu1 %1013 }
 0x23d   : > { %3046 = vrsqrt.f32 %v1162_v24  ;;  %v1109_v12 = vsub.f32 %v1073_v31, %v1091_v27  ;;  %v1074_v48 = vmul.f32 0.0625, %v1014_v36 }
 0x23e   : > { %v945_v55 = vpop.xlane.xlu0 %944  ;;  %3048 = vrsqrt.f32 %v1161_v22 }
 0x23f   : > { %v1127_v56 = vmax.f32 %v1109_v12, 0.0  ;;  %v1110_v54 = vsub.f32 %v1074_v48, %v1092_v43  ;;  %v4052_v62 = vmul.f32 0.0625, %v945_v55 }
 0x240   : > { %v948_v30 = vpop.xlane.xlu1 %947 }
 0x241   : > { %v1163_v52 = vadd.f32 1e-05, %v1127_v56  ;;  %v1128_v58 = vmax.f32 %v1110_v54, 0.0  ;;  %v4054_v4 = vmul.f32 0.0625, %v948_v30  ;;  %v1093_v22 = vmul.f32 %v4052_v62, %v4052_v62 }
 0x242   : > { %v1020_v10 = vpop.xlane.xlu0 %1019  ;;  %v1144_v56 = vsub.f32 %v3912_v19, %v1054_v46  ;;  %v1145_v19 = vsub.f32 %v3923_v0, %v4044_v35 }
 0x243   : > { %3050 = vrsqrt.f32 %v1163_v52  ;;  %v1164_v11 = vadd.f32 1e-05, %v1128_v58  ;;  %v1076_v21 = vmul.f32 0.0625, %v1020_v10  ;;  %v1094_v24 = vmul.f32 %v4054_v4, %v4054_v4 }
 0x244   : > { %v1017_v27 = vpop.xlane.xlu1 %1016 }
 0x245   : > { %3052 = vrsqrt.f32 %v1164_v11  ;;  %v1075_v31 = vmul.f32 0.0625, %v1017_v27  ;;  %v1112_v36 = vsub.f32 %v1076_v21, %v1094_v24  ;;  %v1143_v11 = vsub.f32 %v3910_v20, %v4040_v39 }
 0x246   : > { %v951_v43 = vpop.xlane.xlu0 %950 }
 0x247   : > { %v3047_v12 = vpop.eup %3046  ;;  %v1111_v48 = vsub.f32 %v1075_v31, %v1093_v22  ;;  %v4060_v55 = vmul.f32 0.0625, %v951_v43  ;;  %v1130_v54 = vmax.f32 %v1112_v36, 0.0  ;;  %v4074_v43 = vld [vmem:[%s4734_s10] ss:$0 sm:$0xff] }
 0x248   : > { %v954_v30 = vpop.xlane.xlu1 %953  ;;  %v3049_v52 = vpop.eup %3048  ;;  %v1198_v14 = vmul.f32 %v3047_v12, %v1144_v56  ;;  %v1146_v56 = vsub.f32 %v3926_v15, %v4046_v6 }
 0x249   : > { %v1129_v58 = vmax.f32 %v1111_v48, 0.0  ;;  %v4063_v10 = vmul.f32 0.0625, %v954_v30  ;;  %v1166_v40 = vadd.f32 1e-05, %v1130_v54  ;;  %v1095_v24 = vmul.f32 %v4060_v55, %v4060_v55 }
 0x24a   : > { %v1023_v27 = vpop.xlane.xlu0 %1022  ;;  %v1197_v31 = vmul.f32 %v3049_v52, %v1143_v11  ;;  %v1222_v48 = vmul.f32 %v4074_v43, %v1198_v14 }
 0x24b   : > { %v1165_v21 = vadd.f32 1e-05, %v1129_v58  ;;  %v1077_v22 = vmul.f32 0.0625, %v1023_v27  ;;  %3054 = vrsqrt.f32 %v1166_v40  ;;  %v1096_v20 = vmul.f32 %v4063_v10, %v4063_v10 }
 0x24c   : > { %v1026_v46 = vpop.xlane.xlu1 %1025  ;;  %v4084_v58 = vmul.f32 %v4074_v43, %v1197_v31 }
 0x24d   : > { %v3051_v36 = vpop.eup %3050  ;;  %3056 = vrsqrt.f32 %v1165_v21  ;;  %v1113_v39 = vsub.f32 %v1077_v22, %v1095_v24  ;;  %v1078_v12 = vmul.f32 0.0625, %v1026_v46 }
 0x24e   : > { %v1199_v0 = vmul.f32 %v3051_v36, %v1145_v19  ;;  %v957_v40 = vpop.xlane.xlu0 %956  ;;  %v1238_v6 = vpack.c.bf16 %v1222_v48, %v4084_v58  ;;  %v1147_v48 = vsub.f32 %v3937_v25, %v4052_v62  ;;  %v2999_v25 = vld [vmem:[%s4735_s27 + $0x20] sm:$0xff]   ;;  %v1149_v62 = vsub.f32 %v3951_v33, %v4060_v55 }
 0x24f   : > { %v3053_v35 = vpop.eup %3052  ;;  %v1131_v54 = vmax.f32 %v1113_v39, 0.0  ;;  %v1114_v30 = vsub.f32 %v1078_v12, %v1096_v20  ;;  %v4081_v52 = vmul.f32 0.0625, %v957_v40  ;;  %v1148_v20 = vsub.f32 %v3940_v59, %v4054_v4  ;;  %v2998_v59 = vld [vmem:[%s4735_s27 + $0x18] sm:$0xff]  }
 0x250   : > { %v960_v11 = vpop.xlane.xlu1 %959  ;;  %v1200_v27 = vmul.f32 %v3053_v35, %v1146_v56  ;;  %v1223_v46 = vmul.f32 %v4074_v43, %v1199_v0  ;;  %2785 = vmatprep.subr.bf16.mxu1 %v2998_v59 }
 0x251   : > { %v1167_v21 = vadd.f32 1e-05, %v1131_v54  ;;  %v1132_v24 = vmax.f32 %v1114_v30, 0.0  ;;  %v4086_v22 = vmul.f32 0.0625, %v960_v11  ;;  %v1097_v36 = vmul.f32 %v4081_v52, %v4081_v52  ;;  %2786 = vmatpush3.bf16.msra.mxu1 %v2998_v59 }
 0x252   : > { %v1029_v14 = vpop.xlane.xlu0 %1028  ;;  %v1224_v15 = vmul.f32 %v4074_v43, %v1200_v27  ;;  %v1258_v30 = vunpack.c.h.b16 %v1238_v6  ;;  %2787 = vmatprep.subr.bf16.mxu1 %v2999_v25 }
 0x253   : > { %3058 = vrsqrt.f32 %v1167_v21  ;;  %v1168_v19 = vadd.f32 1e-05, %v1132_v24  ;;  %v1079_v31 = vmul.f32 0.0625, %v1029_v14  ;;  %v1098_v56 = vmul.f32 %v4086_v22, %v4086_v22 }
 0x254   : > { %v1032_v39 = vpop.xlane.xlu1 %1031  ;;  %v1239_v12 = vpack.c.bf16 %v1224_v15, %v1223_v46  ;;  %v2697_v27 = vpack.c.bf16 %v1224_v15, %v1224_v15 }
 0x255   : > { %3060 = vrsqrt.f32 %v1168_v19  ;;  %v1115_v0 = vsub.f32 %v1079_v31, %v1097_v36  ;;  %v1080_v40 = vmul.f32 0.0625, %v1032_v39  ;;  %v3055_v35 = vpop.eup %3054  ;;  %2788 = vmatpush3.bf16.msra.mxu1 %v2999_v25 }
 0x256   : > { %v963_v54 = vpop.xlane.xlu0 %962  ;;  %v1259_v11 = vunpack.c.l.b16 %v1239_v12  ;;  %v1202_v21 = vmul.f32 %v3055_v35, %v1148_v20 }
 0x257   : > { %v3057_v4 = vpop.eup %3056  ;;  %v1133_v24 = vmax.f32 %v1115_v0, 0.0  ;;  %v1116_v14 = vsub.f32 %v1080_v40, %v1098_v56  ;;  %v4109_v31 = vmul.f32 0.0625, %v963_v54  ;;  %v1375_v0 = vrot.slane %v2697_v27, 1 }
 0x258   : > { %v1201_v46 = vmul.f32 %v3057_v4, %v1147_v48  ;;  %v966_v19 = vpop.xlane.xlu1 %965  ;;  %v4102_v36 = vpack.c.b16 %v1259_v11, %v1258_v30  ;;  %v1226_v40 = vmul.f32 %v4074_v43, %v1202_v21  ;;  %v1306_v11 = vshll.u32 %v2697_v27, 16 }
 0x259   : > { %v1169_v15 = vadd.f32 1e-05, %v1133_v24  ;;  %v1134_v6 = vmax.f32 %v1116_v14, 0.0  ;;  %v4112_v39 = vmul.f32 0.0625, %v966_v19  ;;  %v1099_v4 = vmul.f32 %v4109_v31, %v4109_v31  ;;  %v3000_v14 = vld [vmem:[%s4735_s27 + $0x28] sm:$0xff]  }
 0x25a   : > { %v1225_v20 = vmul.f32 %v4074_v43, %v1201_v46  ;;  %v1038_v12 = vpop.xlane.xlu0 %1037  ;;  %v1374_v56 = vrot.slane %v4102_v36, 1  ;;  %v1301_v30 = vshll.u32 %v4102_v36, 16  ;;  %v1299_v27 = vshrl.u32 %v4102_v36, 16  ;;  %2789 = vmatprep.subr.bf16.mxu1 %v3000_v14 }
 0x25b   : > { %3062 = vrsqrt.f32 %v1169_v15  ;;  %v1170_v35 = vadd.f32 1e-05, %v1134_v6  ;;  %v1082_v48 = vmul.f32 0.0625, %v1038_v12  ;;  %v1100_v33 = vmul.f32 %v4112_v39, %v4112_v39  ;;  %2790 = vmatpush3.bf16.msra.mxu1 %v3000_v14 }
 0x25c   : > { %v1035_v55 = vpop.xlane.xlu1 %1034  ;;  %v1376_v54 = vsel %vm1370_vm6, %v1374_v56, %v1375_v0  ;;  %v4123_v21 = vpack.c.bf16 %v1226_v40, %v1225_v20  ;;  %v1303_v15 = vrot.slane %v1301_v30, 1  ;;  %v1150_v56 = vsub.f32 %v3954_v50, %v4063_v10 }
 0x25d   : > { %v3059_v59 = vpop.eup %3058  ;;  %3064 = vrsqrt.f32 %v1170_v35  ;;  %v1081_v24 = vmul.f32 0.0625, %v1035_v55  ;;  %1391 = vrot.lane.b32.xlu1 %v1376_v54, %s3368_s15  ;;  %v1118_v46 = vsub.f32 %v1082_v48, %v1100_v33  ;;  %v1308_v54 = vrot.slane %v1306_v11, 1 }
 0x25e   : > { %v969_v19 = vpop.xlane.xlu0 %968  ;;  %v1203_v6 = vmul.f32 %v3059_v59, %v1149_v62  ;;  %v1313_v20 = vshll.u32 %v4123_v21, 16  ;;  %v1304_v55 = vor.u32 %v1303_v15, %v1299_v27  ;;  %v1151_v27 = vsub.f32 %v3965_v18, %v4081_v52 }
 0x25f   : > { %v3061_v12 = vpop.eup %3060  ;;  %v1117_v0 = vsub.f32 %v1081_v24, %v1099_v4  ;;  %v4131_v35 = vmul.f32 0.0625, %v969_v19  ;;  %v1136_v25 = vmax.f32 %v1118_v46, 0.0 }
 0x260   : > { %v1041_v40 = vpop.xlane.xlu1 %1040  ;;  %v1227_v48 = vmul.f32 %v4074_v43, %v1203_v6  ;;  %v1204_v59 = vmul.f32 %v3061_v12, %v1150_v56  ;;  %v1309_v10 = vsel %vm1285_vm7, %v1304_v55, %v1308_v54  ;;  %v1315_v46 = vrot.slane %v1313_v20, 1 }
 0x261   : > { %v1135_v33 = vmax.f32 %v1117_v0, 0.0  ;;  %v1101_v62 = vmul.f32 %v4131_v35, %v4131_v35  ;;  %v1083_v30 = vmul.f32 0.0625, %v1041_v40  ;;  %v1172_v50 = vadd.f32 1e-05, %v1136_v25  ;;  %1360 = vrot.lane.b32.xlu0 %v1309_v10, %s3369_s28 }
 0x262   : > { %v927_v4 = vpop.xlane.xlu0 %926  ;;  %v2698_v24 = vpack.c.bf16 %v1227_v48, %v1227_v48  ;;  %v1152_v12 = vsub.f32 %v3968_v26, %v4086_v22  ;;  %v1311_v0 = vshrl.u32 %v4123_v21, 16  ;;  %v1228_v18 = vmul.f32 %v4074_v43, %v1204_v59 }
 0x263   : > { %v1171_v19 = vadd.f32 1e-05, %v1135_v33  ;;  %v1119_v16 = vsub.f32 %v1083_v30, %v1101_v62  ;;  %v4139_v11 = vmul.f32 0.0625, %v927_v4  ;;  %3066 = vrsqrt.f32 %v1172_v50 }
 0x264   : > { %v930_v15 = vpop.xlane.xlu1 %929  ;;  %v1318_v14 = vshll.u32 %v2698_v24, 16  ;;  %v1316_v62 = vor.u32 %v1315_v46, %v1311_v0  ;;  %v1378_v22 = vrot.slane %v2698_v24, 1  ;;  %v1377_v24 = vrot.slane %v4123_v21, 1 }
 0x265   : > { %v3063_v6 = vpop.eup %3062  ;;  %3068 = vrsqrt.f32 %v1171_v19  ;;  %v1137_v56 = vmax.f32 %v1119_v16, 0.0  ;;  %v1087_v40 = vmul.f32 %v4139_v11, %v4139_v11  ;;  %v4148_v55 = vmul.f32 0.0625, %v930_v15 }
 0x266   : > { %v1205_v25 = vmul.f32 %v3063_v6, %v1151_v27  ;;  %v999_v20 = vpop.xlane.xlu0 %998  ;;  %v1320_v30 = vrot.slane %v1318_v14, 1  ;;  %v1241_v27 = vpack.c.bf16 %v1228_v18, %v1227_v48  ;;  %v1154_v0 = vsub.f32 %v3983_v3, %v4112_v39 }
 0x267   : > { %v3065_v52 = vpop.eup %3064  ;;  %v1173_v54 = vadd.f32 1e-05, %v1137_v56  ;;  %v1069_v33 = vmul.f32 0.0625, %v999_v20  ;;  %v1088_v26 = vmul.f32 %v4148_v55, %v4148_v55 }
 0x268   : > { %v1002_v16 = vpop.xlane.xlu1 %1001  ;;  %v1206_v50 = vmul.f32 %v3065_v52, %v1152_v12  ;;  %v1321_v19 = vsel %vm1285_vm7, %v1316_v62, %v1320_v30  ;;  %v1229_v15 = vmul.f32 %v4074_v43, %v1205_v25  ;;  %v1153_v12 = vsub.f32 %v3979_v8, %v4109_v31 }
 0x269   : > { %3070 = vrsqrt.f32 %v1173_v54  ;;  %v1105_v10 = vsub.f32 %v1069_v33, %v1087_v40  ;;  %v1070_v4 = vmul.f32 0.0625, %v1002_v16  ;;  %1362 = vrot.lane.b32.xlu1 %v1321_v19, %s3369_s28  ;;  %v1379_v52 = vsel %vm1370_vm6, %v1377_v24, %v1378_v22  ;;  %v4170_v54 = vld [vmem:[%s4735_s27] sm:$0xff]  }
 0x26a   : > { %v972_v59 = vpop.xlane.xlu0 %971  ;;  %v1230_v46 = vmul.f32 %v4074_v43, %v1206_v50  ;;  %v1264_v62 = vunpack.c.h.b16 %v1241_v27  ;;  %2799 = vmatprep.subr.bf16.mxu1 %v4170_v54  ;;  %v1155_v19 = vsub.f32 %v3997_v1, %v4131_v35 }
 0x26b   : > { %v1123_v14 = vmax.f32 %v1105_v10, 0.0  ;;  %v1106_v6 = vsub.f32 %v1070_v4, %v1088_v26  ;;  %v4157_v56 = vmul.f32 0.0625, %v972_v59 }
 0x26c   : > { %v1044_v48 = vpop.xlane.xlu1 %1043  ;;  %v1242_v40 = vpack.c.bf16 %v1230_v46, %v1229_v15  ;;  %v2699_v39 = vpack.c.bf16 %v1230_v46, %v1230_v46 }
 0x26d   : > { %v1159_v20 = vadd.f32 1e-05, %v1123_v14  ;;  %v1124_v18 = vmax.f32 %v1106_v6, 0.0  ;;  %v1102_v25 = vmul.f32 %v4157_v56, %v4157_v56  ;;  %v3067_v33 = vpop.eup %3066  ;;  %v1084_v8 = vmul.f32 0.0625, %v1044_v48  ;;  %1393 = vrot.lane.b32.xlu1 %v1379_v52, %s3368_s15 }
 0x26e   : > { %v978_v3 = vpop.xlane.xlu0 %977  ;;  %v1265_v31 = vunpack.c.l.b16 %v1242_v40  ;;  %v1208_v26 = vmul.f32 %v3067_v33, %v1154_v0  ;;  %v1330_v6 = vshll.u32 %v2699_v39, 16 }
 0x26f   : > { %v3069_v30 = vpop.eup %3068  ;;  %3072 = vrsqrt.f32 %v1159_v20  ;;  %v1160_v16 = vadd.f32 1e-05, %v1124_v18  ;;  %v1120_v50 = vsub.f32 %v1084_v8, %v1102_v25  ;;  %v4178_v27 = vmul.f32 0.0625, %v978_v3 }
 0x270   : > { %v1207_v22 = vmul.f32 %v3069_v30, %v1153_v12  ;;  %v975_v10 = vpop.xlane.xlu1 %974  ;;  %v4174_v4 = vpack.c.b16 %v1265_v31, %v1264_v62  ;;  %v1232_v12 = vmul.f32 %v4074_v43, %v1208_v26  ;;  %v1332_v26 = vrot.slane %v1330_v6, 1 }
 0x271   : > { %3074 = vrsqrt.f32 %v1160_v16  ;;  %v1138_v15 = vmax.f32 %v1120_v50, 0.0  ;;  %v4181_v46 = vmul.f32 0.0625, %v975_v10  ;;  %v1104_v0 = vmul.f32 %v4178_v27, %v4178_v27 }
 0x272   : > { %v1231_v59 = vmul.f32 %v4074_v43, %v1207_v22  ;;  %v1047_v14 = vpop.xlane.xlu0 %1046  ;;  %v1325_v40 = vshll.u32 %v4174_v4, 16  ;;  %v1323_v52 = vshrl.u32 %v4174_v4, 16  ;;  %v1141_v22 = vsub.f32 %v4000_v63, %v4139_v11 }
 0x273   : > { %v3071_v24 = vpop.eup %3070  ;;  %v1085_v48 = vmul.f32 0.0625, %v1047_v14  ;;  %v1174_v1 = vadd.f32 1e-05, %v1138_v15  ;;  %v1103_v35 = vmul.f32 %v4181_v46, %v4181_v46  ;;  %v1142_v50 = vsub.f32 %v4006_v13, %v4148_v55 }
 0x274   : > { %v1050_v20 = vpop.xlane.xlu1 %1049  ;;  %v1209_v18 = vmul.f32 %v3071_v24, %v1155_v19  ;;  %v1327_v33 = vrot.slane %v1325_v40, 1  ;;  %v4190_v62 = vpack.c.bf16 %v1232_v12, %v1231_v59  ;;  %v1380_v24 = vrot.slane %v4174_v4, 1 }
 0x275   : > { %v1086_v25 = vmul.f32 0.0625, %v1050_v20  ;;  %3076 = vrsqrt.f32 %v1174_v1  ;;  %v1121_v8 = vsub.f32 %v1085_v48, %v1103_v35  ;;  %v1381_v55 = vrot.slane %v2699_v39, 1 }
 0x276   : > { %v4193_v3 = vmul.f32 %v4074_v43, %v1209_v18  ;;  %v1328_v30 = vor.u32 %v1327_v33, %v1323_v52  ;;  %v1337_v16 = vshll.u32 %v4190_v62, 16  ;;  %v1335_v63 = vshrl.u32 %v4190_v62, 16 }
 0x277   : > { %v1122_v31 = vsub.f32 %v1086_v25, %v1104_v0  ;;  %v1139_v10 = vmax.f32 %v1121_v8, 0.0  ;;  %v1382_v20 = vsel %vm1370_vm6, %v1380_v24, %v1381_v55  ;;  %v2696_v18 = vpack.c.bf16 %v4084_v58, %v4084_v58 }
 0x278   : > { %v2700_v19 = vpack.c.bf16 %v4193_v3, %v4193_v3  ;;  %v1333_v14 = vsel %vm1285_vm7, %v1328_v30, %v1332_v26  ;;  %v1339_v12 = vrot.slane %v1337_v16, 1  ;;  %v1383_v30 = vrot.slane %v4190_v62, 1 }
 0x279   : > { %v3073_v59 = vpop.eup %3072  ;;  %v1140_v15 = vmax.f32 %v1122_v31, 0.0  ;;  %v1175_v0 = vadd.f32 1e-05, %v1139_v10  ;;  %1364 = vrot.lane.b32.xlu0 %v1333_v14, %s3369_s28  ;;  %v1156_v31 = vsub.f32 %v4015_v57, %v4157_v56  ;;  %v1294_v58 = vshll.u32 %v2696_v18, 16 }
 0x27a   : > { %v1195_v6 = vmul.f32 %v3073_v59, %v1141_v22  ;;  %v1342_v11 = vshll.u32 %v2700_v19, 16  ;;  %v1340_v1 = vor.u32 %v1339_v12, %v1335_v63  ;;  %v1384_v52 = vrot.slane %v2700_v19, 1 }
 0x27b   : > { %v3075_v48 = vpop.eup %3074  ;;  %v1176_v13 = vadd.f32 1e-05, %v1140_v15  ;;  %3078 = vrsqrt.f32 %v1175_v0  ;;  %v1372_v19 = vrot.slane %v2696_v18, 1  ;;  %v1157_v57 = vsub.f32 %v4020_v44, %v4181_v46 }
 0x27c   : > { %v1196_v40 = vmul.f32 %v3075_v48, %v1142_v50  ;;  %v1344_v35 = vrot.slane %v1342_v11, 1  ;;  %v1219_v33 = vmul.f32 %v4074_v43, %v1195_v6  ;;  %v1385_v22 = vsel %vm1370_vm6, %v1383_v30, %v1384_v52 }
 0x27d   : > { %3080 = vrsqrt.f32 %v1176_v13  ;;  %1395 = vrot.lane.b32.xlu0 %v1382_v20, %s3368_s15  ;;  %v1296_v56 = vrot.slane %v1294_v58, 1  ;;  %v1158_v24 = vsub.f32 %v4022_v2, %v4178_v27 }
 0x27e   : > { %v1345_v25 = vsel %vm1285_vm7, %v1340_v1, %v1344_v35  ;;  %v1220_v8 = vmul.f32 %v4074_v43, %v1196_v40 }
 0x27f   : > { %1366 = vrot.lane.b32.xlu1 %v1345_v25, %s3369_s28  ;;  %v3077_v39 = vpop.eup %3076 }
 0x280   : > { %v4217_v26 = vpack.c.bf16 %v1220_v8, %v1219_v33  ;;  %v1210_v16 = vmul.f32 %v3077_v39, %v1156_v31 }
 0x282   : > { %v1371_v50 = vrot.slane %v4217_v26, 1  ;;  %v1289_v10 = vshll.u32 %v4217_v26, 16  ;;  %v1287_v59 = vshrl.u32 %v4217_v26, 16  ;;  %v1234_v12 = vmul.f32 %v4074_v43, %v1210_v16 }
 0x283   : > { %1397 = vrot.lane.b32.xlu1 %v1385_v22, %s3368_s15 }
 0x284   : > { %v1291_v15 = vrot.slane %v1289_v10, 1  ;;  %v1373_v6 = vsel %vm1370_vm6, %v1371_v50, %v1372_v19  ;;  %v1244_v44 = vpack.c.bf16 %v1234_v12, %v4193_v3 }
 0x285   : > { %v3079_v14 = vpop.eup %3078 }
 0x286   : > { %v1292_v0 = vor.u32 %v1291_v15, %v1287_v59  ;;  %v1211_v11 = vmul.f32 %v3079_v14, %v1157_v57  ;;  %v1270_v55 = vunpack.c.h.b16 %v1244_v44  ;;  %v3002_v59 = vld [vmem:[%s4735_s27 + $0x8] sm:$0xff]  }
 0x287   : > { %v3081_v63 = vpop.eup %3080  ;;  %1389 = vrot.lane.b32.xlu1 %v1373_v6, %s3368_s15 }
 0x288   : > { %v1297_v48 = vsel %vm1285_vm7, %v1292_v0, %v1296_v56  ;;  %v1212_v13 = vmul.f32 %v3081_v63, %v1158_v24  ;;  %v1235_v46 = vmul.f32 %v4074_v43, %v1211_v11 }
 0x289   : > { %1358 = vrot.lane.b32.xlu0 %v1297_v48, %s3369_s28 }
 0x28a   : > { %v1236_v2 = vmul.f32 %v4074_v43, %v1212_v13  ;;  %v3005_v13 = vld [vmem:[%s4735_s27 + $0x38] sm:$0xff]  }
 0x28c   : > { %v1245_v27 = vpack.c.bf16 %v1236_v2, %v1235_v46  ;;  %v2701_v1 = vpack.c.bf16 %v1236_v2, %v1236_v2 }
 0x28e   : > { %v1271_v40 = vunpack.c.l.b16 %v1245_v27  ;;  %v1387_v18 = vrot.slane %v2701_v1, 1  ;;  %v1354_v52 = vshll.u32 %v2701_v1, 16 }
 0x290   : > { %v4236_v35 = vpack.c.b16 %v1271_v40, %v1270_v55  ;;  %v1356_v39 = vrot.slane %v1354_v52, 1  ;;  %v3006_v55 = vld [vmem:[%s4735_s27 + $0x40] sm:$0xff]  }
 0x292   : > { %v1386_v20 = vrot.slane %v4236_v35, 1  ;;  %v1349_v25 = vshll.u32 %v4236_v35, 16  ;;  %v1347_v3 = vshrl.u32 %v4236_v35, 16 }
 0x294   : > { %v1388_v33 = vsel %vm1370_vm6, %v1386_v20, %v1387_v18  ;;  %v1351_v8 = vrot.slane %v1349_v25, 1 }
 0x295   : > { %1399 = vrot.lane.b32.xlu1 %v1388_v33, %s3368_s15  ;;  %s4736_s15 = sld [smem:[#allocation22_spill]] }
 0x296   : > { %v1352_v43 = vor.u32 %v1351_v8, %v1347_v3 }
 0x298   : > { %v1357_v31 = vsel %vm1285_vm7, %v1352_v43, %v1356_v39 }
 0x299   : > { %1368 = vrot.lane.b32.xlu0 %v1357_v31, %s3369_s28  ;;  %s4737_s28 = sld [smem:[#allocation24_spill]] }
 0x2cf   : > { %v1392_v58 = vpop.permute.xlu1 %1391 }
 0x2d3   : > { %v1361_v30 = vpop.permute.xlu0 %1360 }
 0x2d4   : > { %v1404_v16 = vsel %vm924_vm5, %v4102_v36, %v1361_v30  ;;  %v3003_v36 = vld [vmem:[%s4735_s27 + $0x10] sm:$0xff]  }
 0x2d5   : > { %v1418_v22 = vsel %vm1413_vm8, %v1404_v16, %v1392_v58 }
 0x2d6   : > { %2791 = vmatprep.mubr.msk.bf16.mxu1 %vm1454_vm9, %v1418_v22  ;;  %v1440_v2 = vunpack.c.l.bf16 %v1418_v22  ;;  %v1441_v52 = vunpack.c.h.bf16 %v1418_v22 }
 0x2d8   : > { %v1448_v25 = vmul.f32 %v1440_v2, %v1440_v2  ;;  %v1449_v39 = vmul.f32 %v1441_v52, %v1441_v52 }
 0x2da   : > { %v1461_v43 = vsel %vm1454_vm9, %v1448_v25, 0.0  ;;  %v1464_v16 = vsel %vm1454_vm9, %v1449_v39, 0.0 }
 0x2db   : > { %v1363_v50 = vpop.permute.xlu1 %1362 }
 0x2dc   : > { %v1406_v10 = vsel %vm924_vm5, %v4123_v21, %v1363_v50  ;;  %v3004_v21 = vld [vmem:[%s4735_s27 + $0x30] sm:$0xff]  }
 0x2df   : > { %v1394_v19 = vpop.permute.xlu1 %1393 }
 0x2e0   : > { %v4255_v15 = vsel %vm1413_vm8, %v1406_v10, %v1394_v19 }
 0x2e1   : > { %2792 = vmatmul.mubr.msk.bf16.vlgmr.msra.gmra.mrb[0].mxu1 %vm1454_vm9, %v4255_v15  ;;  %v1443_v46 = vunpack.c.h.bf16 %v4255_v15  ;;  %v1442_v31 = vunpack.c.l.bf16 %v4255_v15 }
 0x2e2   : > { %2800 = vmatpush3.bf16.msra.mxu1 %v4170_v54 }
 0x2e3   : > { %2801 = vmatprep.subr.bf16.mxu1 %v3002_v59  ;;  %v1451_v20 = vmul.f32 %v1443_v46, %v1443_v46  ;;  %v1450_v50 = vmul.f32 %v1442_v31, %v1442_v31 }
 0x2e5   : > { %v1470_v33 = vsel %vm1454_vm9, %v1451_v20, 0.0 }
 0x2e6   : > { %2802 = vmatpush3.bf16.msra.mxu1 %v3002_v59 }
 0x2e7   : > { %2803 = vmatprep.subr.bf16.mxu1 %v3003_v36 }
 0x2ea   : > { %2804 = vmatpush3.bf16.msra.mxu1 %v3003_v36 }
 0x2eb   : > { %v1365_v57 = vpop.permute.xlu0 %1364  ;;  %2813 = vmatprep.subr.bf16.mxu1 %v3004_v21 }
 0x2ec   : > { %v1408_v56 = vsel %vm924_vm5, %v4174_v4, %v1365_v57  ;;  %v1467_v57 = vsel %vm1454_vm9, %v1450_v50, 0.0 }
 0x2ef   : > { %v1396_v14 = vpop.permute.xlu0 %1395 }
 0x2f0   : > { %v1424_v54 = vsel %vm1413_vm8, %v1408_v56, %v1396_v14 }
 0x2f1   : > { %v1367_v24 = vpop.permute.xlu1 %1366  ;;  %2795 = vmatprep.mubr.msk.bf16.mxu1 %vm1454_vm9, %v1424_v54  ;;  %v1445_v18 = vunpack.c.h.bf16 %v1424_v54  ;;  %v1444_v10 = vunpack.c.l.bf16 %v1424_v54 }
 0x2f2   : > { %v1410_v12 = vsel %vm924_vm5, %v4190_v62, %v1367_v24 }
 0x2f3   : > { %v1453_v3 = vmul.f32 %v1445_v18, %v1445_v18  ;;  %v1452_v56 = vmul.f32 %v1444_v10, %v1444_v10 }
 0x2f5   : > { %v1398_v6 = vpop.permute.xlu1 %1397  ;;  %v1476_v30 = vsel %vm1454_vm9, %v1453_v3, 0.0 }
 0x2f6   : > { %v4273_v0 = vsel %vm1413_vm8, %v1410_v12, %v1398_v6  ;;  %v1473_v12 = vsel %vm1454_vm9, %v1452_v56, 0.0 }
 0x2f7   : > { %2796 = vmatmul.mubr.msk.bf16.gmra.mrb[4].mxu1 %vm1454_vm9, %v4273_v0  ;;  %v1671_v8 = vunpack.c.h.bf16 %v4273_v0  ;;  %v1670_v14 = vunpack.c.l.bf16 %v4273_v0 }
 0x2f9   : > { %v1390_v11 = vpop.permute.xlu1 %1389  ;;  %v1673_v58 = vmul.f32 %v1671_v8, %v1671_v8  ;;  %v1672_v6 = vmul.f32 %v1670_v14, %v1670_v14 }
 0x2fb   : > { %v1359_v63 = vpop.permute.xlu0 %1358 }
 0x2fc   : > { %v1402_v4 = vsel %vm924_vm5, %v4217_v26, %v1359_v63 }
 0x2fd   : > { %v1415_v48 = vsel %vm1413_vm8, %v1402_v4, %v1390_v11 }
 0x2fe   : > { %2805 = vmatprep.mubr.msk.bf16.mxu1 %vm1454_vm9, %v1415_v48  ;;  %v1439_v62 = vunpack.c.h.bf16 %v1415_v48  ;;  %v1438_v44 = vunpack.c.l.bf16 %v1415_v48 }
 0x2ff   : > { %2806 = vmatmul.mubr.msk.bf16.vlgmr.msra.gmra.mrb[0].mxu1 %vm1454_vm9, %v1418_v22 }
 0x300   : > { %2814 = vmatpush3.bf16.msra.mxu1 %v3004_v21  ;;  %2809 = vmatprep.mubr.msk.bf16.mxu1 %vm1454_vm9, %v4255_v15  ;;  %v1447_v26 = vmul.f32 %v1439_v62, %v1439_v62  ;;  %v1446_v27 = vmul.f32 %v1438_v44, %v1438_v44  ;;  %v1677_v21 = vsel %vm1454_vm9, %v1673_v58, 0.0 }
 0x301   : > { %2815 = vmatprep.subr.bf16.mxu1 %v3005_v13 }
 0x302   : > { %v1458_v40 = vsel %vm1454_vm9, %v1447_v26, 0.0  ;;  %v1455_v1 = vsel %vm1454_vm9, %v1446_v27, 0.0 }
 0x303   : > { %1459 = vadd.xlane.f32.xlu1 %v1458_v40  ;;  %1456 = vadd.xlane.f32.xlu0 %v1455_v1 }
 0x304   : > { %2816 = vmatpush3.bf16.msra.mxu1 %v3005_v13 }
 0x305   : > { %2817 = vmatprep.subr.bf16.mxu1 %v3006_v55 }
 0x307   : > { %2810 = vmatmul.mubr.msk.bf16.gmra.mrb[4].mxu1 %vm1454_vm9, %v1424_v54  ;;  %1471 = vadd.xlane.f32.xlu1 %v1470_v33  ;;  %v1400_v19 = vpop.permute.xlu1 %1399 }
 0x308   : > { %1462 = vadd.xlane.f32.xlu0 %v1461_v43  ;;  %2819 = vmatprep.mubr.msk.bf16.mxu1 %vm1454_vm9, %v4255_v15 }
 0x309   : > { %2818 = vmatpush3.bf16.msra.mxu1 %v3006_v55 }
 0x30b   : > { %1477 = vadd.xlane.f32.xlu1 %v1476_v30  ;;  %v1369_v22 = vpop.permute.xlu0 %1368 }
 0x30c   : > { %1465 = vadd.xlane.f32.xlu0 %v1464_v16  ;;  %v1412_v59 = vsel %vm924_vm5, %v4236_v35, %v1369_v22 }
 0x30d   : > { %v1430_v36 = vsel %vm1413_vm8, %v1412_v59, %v1400_v19 }
 0x30e   : > { %v1789_v15 = vunpack.c.h.bf16 %v1430_v36  ;;  %v1788_v63 = vunpack.c.l.bf16 %v1430_v36 }
 0x30f   : > { %2820 = vmatmul.mubr.msk.bf16.vlgmr.msra.gmra.mrb[0].mxu1 %vm1454_vm9, %v1424_v54  ;;  %1678 = vadd.xlane.f32.xlu1 %v1677_v21  ;;  %v1674_v54 = vsel %vm1454_vm9, %v1672_v6, 0.0 }
 0x310   : > { %1468 = vadd.xlane.f32.xlu0 %v1467_v57  ;;  %2823 = vmatprep.mubr.msk.bf16.mxu1 %vm1454_vm9, %v4273_v0  ;;  %v1791_v24 = vmul.f32 %v1789_v15, %v1789_v15  ;;  %v1790_v11 = vmul.f32 %v1788_v63, %v1788_v63 }
 0x312   : > { %v1795_v35 = vsel %vm1454_vm9, %v1791_v24, 0.0  ;;  %v1792_v4 = vsel %vm1454_vm9, %v1790_v11, 0.0 }
 0x313   : > { %1796 = vadd.xlane.f32.xlu1 %v1795_v35 }
 0x314   : > { %1474 = vadd.xlane.f32.xlu0 %v1473_v12 }
 0x317   : > { %2824 = vmatmul.mubr.msk.bf16.gmra.mrb[4].mxu1 %vm1454_vm9, %v1430_v36 }
 0x318   : > { %1675 = vadd.xlane.f32.xlu0 %v1674_v54 }
 0x31c   : > { %1793 = vadd.xlane.f32.xlu0 %v1792_v4 }
 0x390   : > { %v1457_v48 = vpop.xlane.xlu0 %1456  ;;  %v1460_v62 = vpop.xlane.xlu1 %1459 }
 0x394   : > { %v1472_v46 = vpop.xlane.xlu1 %1471 }
 0x395   : > { %v1463_v0 = vpop.xlane.xlu0 %1462 }
 0x396   : > { %v1680_v55 = vadd.f32 %v1463_v0, %v1457_v48 }
 0x398   : > { %v1478_v40 = vpop.xlane.xlu1 %1477 }
 0x399   : > { %v1466_v13 = vpop.xlane.xlu0 %1465  ;;  %v1685_v21 = vadd.f32 %v1478_v40, %v1472_v46 }
 0x39a   : > { %v1683_v2 = vadd.f32 %v1472_v46, %v1466_v13  ;;  %v1681_v1 = vadd.f32 %v1466_v13, %v1460_v62 }
 0x39c   : > { %v1801_v18 = vadd.f32 %v1683_v2, %v1478_v40  ;;  %v1799_v52 = vadd.f32 %v1681_v1, %v1472_v46  ;;  %v1679_v39 = vpop.xlane.xlu1 %1678 }
 0x39d   : > { %v1469_v44 = vpop.xlane.xlu0 %1468  ;;  %v1687_v50 = vadd.f32 %v1679_v39, %v1478_v40  ;;  %v1803_v12 = vadd.f32 %v1685_v21, %v1679_v39 }
 0x39e   : > { %v1682_v27 = vadd.f32 %v1469_v44, %v1463_v0  ;;  %v1798_v25 = vadd.f32 %v1680_v55, %v1469_v44  ;;  %v1826_v8 = vadd.f32 1e-06, %v1801_v18  ;;  %v1824_v31 = vadd.f32 1e-06, %v1799_v52 }
 0x39f   : > { %v1828_v40 = vadd.f32 1e-06, %v1803_v12 }
 0x3a0   : > { %v1823_v43 = vadd.f32 1e-06, %v1798_v25  ;;  %v1797_v16 = vpop.xlane.xlu1 %1796 }
 0x3a1   : > { %v1475_v26 = vpop.xlane.xlu0 %1474  ;;  %v1805_v10 = vadd.f32 %v1797_v16, %v1687_v50 }
 0x3a2   : > { %v1800_v20 = vadd.f32 %v1682_v27, %v1475_v26  ;;  %v1684_v19 = vadd.f32 %v1475_v26, %v1469_v44 }
 0x3a3   : > { %v1830_v6 = vadd.f32 1e-06, %v1805_v10 }
 0x3a4   : > { %v1825_v33 = vadd.f32 1e-06, %v1800_v20 }
 0x3a5   : > { %v1676_v3 = vpop.xlane.xlu0 %1675 }
 0x3a6   : > { %3082 = vrsqrt.f32 %v1825_v33  ;;  %v1686_v58 = vadd.f32 %v1676_v3, %v1475_v26  ;;  %v1802_v15 = vadd.f32 %v1684_v19, %v1676_v3 }
 0x3a7   : > { %3084 = vrsqrt.f32 %v1826_v8 }
 0x3a8   : > { %3086 = vrsqrt.f32 %v1823_v43  ;;  %v1827_v62 = vadd.f32 1e-06, %v1802_v15 }
 0x3a9   : > { %v1794_v30 = vpop.xlane.xlu0 %1793  ;;  %3088 = vrsqrt.f32 %v1824_v31 }
 0x3aa   : > { %v1804_v22 = vadd.f32 %v1794_v30, %v1686_v58 }
 0x3ac   : > { %v1829_v59 = vadd.f32 1e-06, %v1804_v22 }
 0x3ae   : > { %3090 = vrsqrt.f32 %v1829_v59 }
 0x3af   : > { %3092 = vrsqrt.f32 %v1830_v6 }
 0x3b0   : > { %v3083_v36 = vpop.eup %3082  ;;  %3094 = vrsqrt.f32 %v1827_v62 }
 0x3b1   : > { %v3085_v56 = vpop.eup %3084  ;;  %v1841_v4 = vmul.f32 8.333333, %v3083_v36  ;;  %3096 = vrsqrt.f32 %v1828_v40 }
 0x3b2   : > { %v3087_v35 = vpop.eup %3086  ;;  %v1842_v55 = vmul.f32 8.333333, %v3085_v56 }
 0x3b3   : > { %v3089_v13 = vpop.eup %3088  ;;  %v1839_v26 = vmul.f32 8.333333, %v3087_v35 }
 0x3b4   : > { %v1840_v25 = vmul.f32 8.333333, %v3089_v13 }
 0x3b8   : > { %v3091_v22 = vpop.eup %3090 }
 0x3b9   : > { %v1845_v56 = vmul.f32 8.333333, %v3091_v22 }
 0x3e2   : > { %v2821_v57 = vpop.f32.mrb[0].mxu1 }
 0x3e3   : > { %v1809_v14 = vand.u32 2147483647, %v2821_v57  ;;  %v1749_v24 = vpop.f32.mrb[1].mxu1 }
 0x3e4   : > { %v1807_v63 = vand.u32 2147483647, %v1749_v24  ;;  %v2822_v54 = vpop.f32.mrb[2].mxu1 }
 0x3e5   : > { %v1817_v11 = vmul.f32 %v2821_v57, %v1809_v14  ;;  %v1810_v48 = vand.u32 2147483647, %v2822_v54  ;;  %v1752_v0 = vpop.f32.mrb[3].mxu1  ;;  %v3093_v57 = vpop.eup %3092 }
 0x3e6   : > { %v1815_v44 = vmul.f32 %v1807_v63, %v1749_v24  ;;  %v1808_v2 = vand.u32 2147483647, %v1752_v0  ;;  %v3095_v6 = vpop.eup %3094  ;;  %v1846_v63 = vmul.f32 8.333333, %v3093_v57 }
 0x3e7   : > { %v4316_v46 = vmul.f32 %v1841_v4, %v1817_v11  ;;  %v1818_v27 = vmul.f32 %v2822_v54, %v1810_v48  ;;  %v3097_v48 = vpop.eup %3096 }
 0x3e8   : > { %v1816_v1 = vmul.f32 %v1808_v2, %v1752_v0  ;;  %v4318_v20 = vmul.f32 %v1839_v26, %v1815_v44  ;;  %v1843_v0 = vmul.f32 8.333333, %v3095_v6  ;;  %v1844_v2 = vmul.f32 8.333333, %v3097_v48 }
 0x3e9   : > { %v4320_v18 = vmul.f32 %v1842_v55, %v1818_v27  ;;  %v1861_v52 = vsel %vm924_vm5, %v4316_v46, 0.0  ;;  %v1881_v16 = vmul.f32 %v4316_v46, %v4316_v46 }
 0x3ea   : > { %v2825_v33 = vpop.f32.mrb[4].mxu1  ;;  %1862 = vadd.xlane.f32.xlu0 %v1861_v52  ;;  %v4324_v3 = vmul.f32 %v1840_v25, %v1816_v1  ;;  %v1855_v58 = vsel %vm924_vm5, %v4318_v20, 0.0  ;;  %v1879_v15 = vmul.f32 %v4318_v20, %v4318_v20 }
 0x3eb   : > { %v1765_v8 = vpop.f32.mrb[5].mxu1  ;;  %v1864_v43 = vsel %vm924_vm5, %v4320_v18, 0.0  ;;  %v1813_v31 = vand.u32 2147483647, %v2825_v33  ;;  %v1882_v19 = vmul.f32 %v4320_v18, %v4320_v18  ;;  %v1893_v21 = vsel %vm924_vm5, %v1881_v16, 0.0  ;;  %v3007_v16 = vld [vmem:[%s4736_s15] sm:$0xff]  }
 0x3ec   : > { %v2826_v39 = vpop.f32.mrb[6].mxu1  ;;  %1865 = vadd.xlane.f32.xlu1 %v1864_v43  ;;  %v1858_v10 = vsel %vm924_vm5, %v4324_v3, 0.0  ;;  %v1811_v36 = vand.u32 2147483647, %v1765_v8  ;;  %v1880_v12 = vmul.f32 %v4324_v3, %v4324_v3  ;;  %v1887_v4 = vsel %vm924_vm5, %v1879_v15, 0.0  ;;  %2827 = vmatprep.subr.bf16.mxu1 %v3007_v16 }
 0x3ed   : > { %v1768_v30 = vpop.f32.mrb[7].mxu1  ;;  %v1814_v50 = vand.u32 2147483647, %v2826_v39  ;;  %v1821_v59 = vmul.f32 %v2825_v33, %v1813_v31  ;;  %v1896_v35 = vsel %vm924_vm5, %v1882_v19, 0.0  ;;  %2828 = vmatpush3.bf16.msra.mxu1 %v3007_v16 }
 0x3ee   : > { %1856 = vadd.xlane.f32.xlu0 %v1855_v58  ;;  %v1812_v24 = vand.u32 2147483647, %v1768_v30  ;;  %v1819_v11 = vmul.f32 %v1811_v36, %v1765_v8  ;;  %v1890_v44 = vsel %vm924_vm5, %v1880_v12, 0.0 }
 0x3ef   : > { %v1822_v14 = vmul.f32 %v2826_v39, %v1814_v50  ;;  %v4342_v54 = vmul.f32 %v1845_v56, %v1821_v59 }
 0x3f0   : > { %1859 = vadd.xlane.f32.xlu1 %v1858_v10  ;;  %v1820_v62 = vmul.f32 %v1812_v24, %v1768_v30  ;;  %v4348_v26 = vmul.f32 %v1843_v0, %v1819_v11 }
 0x3f1   : > { %v4345_v13 = vmul.f32 %v1846_v63, %v1822_v14  ;;  %v1873_v27 = vsel %vm924_vm5, %v4342_v54, 0.0  ;;  %v1885_v43 = vmul.f32 %v4342_v54, %v4342_v54 }
 0x3f2   : > { %1894 = vadd.xlane.f32.xlu0 %v1893_v21  ;;  %v4352_v55 = vmul.f32 %v1844_v2, %v1820_v62  ;;  %v1867_v1 = vsel %vm924_vm5, %v4348_v26, 0.0  ;;  %v1883_v25 = vmul.f32 %v4348_v26, %v4348_v26 }
 0x3f3   : > { %v1876_v40 = vsel %vm924_vm5, %v4345_v13, 0.0  ;;  %v1886_v31 = vmul.f32 %v4345_v13, %v4345_v13  ;;  %v1905_v30 = vsel %vm924_vm5, %v1885_v43, 0.0 }
 0x3f4   : > { %1897 = vadd.xlane.f32.xlu1 %v1896_v35  ;;  %v1870_v52 = vsel %vm924_vm5, %v4352_v55, 0.0  ;;  %v1884_v33 = vmul.f32 %v4352_v55, %v4352_v55  ;;  %v1899_v8 = vsel %vm924_vm5, %v1883_v25, 0.0 }
 0x3f5   : > { %v1908_v58 = vsel %vm924_vm5, %v1886_v31, 0.0 }
 0x3f6   : > { %1888 = vadd.xlane.f32.xlu0 %v1887_v4  ;;  %v1902_v39 = vsel %vm924_vm5, %v1884_v33, 0.0 }
 0x3f8   : > { %1891 = vadd.xlane.f32.xlu1 %v1890_v44 }
 0x3fa   : > { %1874 = vadd.xlane.f32.xlu0 %v1873_v27 }
 0x3fc   : > { %1877 = vadd.xlane.f32.xlu1 %v1876_v40 }
 0x3fe   : > { %1868 = vadd.xlane.f32.xlu0 %v1867_v1 }
 0x400   : > { %1871 = vadd.xlane.f32.xlu1 %v1870_v52 }
 0x402   : > { %1900 = vadd.xlane.f32.xlu0 %v1899_v8 }
 0x404   : > { %1903 = vadd.xlane.f32.xlu1 %v1902_v39 }
 0x406   : > { %1906 = vadd.xlane.f32.xlu0 %v1905_v30 }
 0x408   : > { %1909 = vadd.xlane.f32.xlu1 %v1908_v58 }
 0x477   : > { %v1863_v22 = vpop.xlane.xlu0 %1862 }
 0x478   : > { %v1913_v19 = vmul.f32 0.0625, %v1863_v22 }
 0x479   : > { %v1866_v50 = vpop.xlane.xlu1 %1865 }
 0x47a   : > { %v1914_v36 = vmul.f32 0.0625, %v1866_v50  ;;  %v1929_v15 = vmul.f32 %v1913_v19, %v1913_v19 }
 0x47b   : > { %v1857_v10 = vpop.xlane.xlu0 %1856 }
 0x47c   : > { %v4375_v57 = vmul.f32 0.0625, %v1857_v10  ;;  %v1930_v35 = vmul.f32 %v1914_v36, %v1914_v36 }
 0x47d   : > { %v1860_v59 = vpop.xlane.xlu1 %1859 }
 0x47e   : > { %v4377_v14 = vmul.f32 0.0625, %v1860_v59  ;;  %v1927_v11 = vmul.f32 %v4375_v57, %v4375_v57 }
 0x47f   : > { %v1895_v21 = vpop.xlane.xlu0 %1894 }
 0x480   : > { %v1921_v56 = vmul.f32 0.0625, %v1895_v21  ;;  %v1928_v62 = vmul.f32 %v4377_v14, %v4377_v14 }
 0x481   : > { %v1898_v24 = vpop.xlane.xlu1 %1897 }
 0x482   : > { %v1937_v12 = vsub.f32 %v1921_v56, %v1929_v15  ;;  %v1922_v6 = vmul.f32 0.0625, %v1898_v24  ;;  %v1953_v56 = vsub.f32 %v4316_v46, %v1913_v19  ;;  %v4402_v19 = vld [vmem:[%s4737_s28] ss:$0 sm:$0xff] }
 0x483   : > { %v1889_v63 = vpop.xlane.xlu0 %1888 }
 0x484   : > { %v1945_v4 = vmax.f32 %v1937_v12, 0.0  ;;  %v1938_v48 = vsub.f32 %v1922_v6, %v1930_v35  ;;  %v1919_v0 = vmul.f32 0.0625, %v1889_v63 }
 0x485   : > { %v1892_v44 = vpop.xlane.xlu1 %1891 }
 0x486   : > { %v1961_v2 = vadd.f32 1e-05, %v1945_v4  ;;  %v1946_v27 = vmax.f32 %v1938_v48, 0.0  ;;  %v1935_v40 = vsub.f32 %v1919_v0, %v1927_v11  ;;  %v1920_v1 = vmul.f32 0.0625, %v1892_v44 }
 0x487   : > { %v1875_v25 = vpop.xlane.xlu0 %1874  ;;  %v1954_v4 = vsub.f32 %v4320_v18, %v1914_v36 }
 0x488   : > { %3098 = vrsqrt.f32 %v1961_v2  ;;  %v1962_v52 = vadd.f32 1e-05, %v1946_v27  ;;  %v1943_v33 = vmax.f32 %v1935_v40, 0.0  ;;  %v1936_v8 = vsub.f32 %v1920_v1, %v1928_v62 }
 0x489   : > { %v1878_v43 = vpop.xlane.xlu1 %1877  ;;  %v4387_v59 = vmul.f32 0.0625, %v1875_v25  ;;  %v1951_v40 = vsub.f32 %v4318_v20, %v4375_v57 }
 0x48a   : > { %3100 = vrsqrt.f32 %v1962_v52  ;;  %v1959_v39 = vadd.f32 1e-05, %v1943_v33  ;;  %v1944_v31 = vmax.f32 %v1936_v8, 0.0  ;;  %v4392_v24 = vmul.f32 0.0625, %v1878_v43 }
 0x48b   : > { %v1869_v30 = vpop.xlane.xlu0 %1868  ;;  %v1933_v44 = vmul.f32 %v4387_v59, %v4387_v59 }
 0x48c   : > { %3102 = vrsqrt.f32 %v1959_v39  ;;  %v1960_v58 = vadd.f32 1e-05, %v1944_v31  ;;  %v4383_v16 = vmul.f32 0.0625, %v1869_v30  ;;  %v1934_v18 = vmul.f32 %v4392_v24, %v4392_v24 }
 0x48d   : > { %v1872_v22 = vpop.xlane.xlu1 %1871  ;;  %v1952_v39 = vsub.f32 %v4324_v3, %v4377_v14 }
 0x48e   : > { %3104 = vrsqrt.f32 %v1960_v58  ;;  %v4385_v50 = vmul.f32 0.0625, %v1872_v22  ;;  %v1931_v21 = vmul.f32 %v4383_v16, %v4383_v16 }
 0x48f   : > { %v1901_v10 = vpop.xlane.xlu0 %1900 }
 0x490   : > { %v1923_v15 = vmul.f32 0.0625, %v1901_v10  ;;  %v1932_v6 = vmul.f32 %v4385_v50, %v4385_v50 }
 0x491   : > { %v1904_v35 = vpop.xlane.xlu1 %1903 }
 0x492   : > { %v3099_v12 = vpop.eup %3098  ;;  %v1939_v63 = vsub.f32 %v1923_v15, %v1931_v21  ;;  %v1924_v11 = vmul.f32 0.0625, %v1904_v35 }
 0x493   : > { %v1907_v48 = vpop.xlane.xlu0 %1906  ;;  %v1977_v0 = vmul.f32 %v3099_v12, %v1953_v56 }
 0x494   : > { %v3101_v62 = vpop.eup %3100  ;;  %v1947_v2 = vmax.f32 %v1939_v63, 0.0  ;;  %v1940_v27 = vsub.f32 %v1924_v11, %v1932_v6  ;;  %v1925_v46 = vmul.f32 0.0625, %v1907_v48 }
 0x495   : > { %v1910_v36 = vpop.xlane.xlu1 %1909  ;;  %v1978_v1 = vmul.f32 %v3101_v62, %v1954_v4  ;;  %v1991_v30 = vmul.f32 %v4402_v19, %v1977_v0 }
 0x496   : > { %v3103_v25 = vpop.eup %3102  ;;  %v1963_v52 = vadd.f32 1e-05, %v1947_v2  ;;  %v1948_v33 = vmax.f32 %v1940_v27, 0.0  ;;  %v1941_v8 = vsub.f32 %v1925_v46, %v1933_v44  ;;  %v1926_v43 = vmul.f32 0.0625, %v1910_v36 }
 0x497   : > { %v1975_v31 = vmul.f32 %v3103_v25, %v1951_v40  ;;  %v1992_v58 = vmul.f32 %v4402_v19, %v1978_v1  ;;  %v1955_v27 = vsub.f32 %v4348_v26, %v4383_v16  ;;  %v1956_v36 = vsub.f32 %v4352_v55, %v4385_v50 }
 0x498   : > { %v3105_v22 = vpop.eup %3104  ;;  %3106 = vrsqrt.f32 %v1963_v52  ;;  %v1964_v20 = vadd.f32 1e-05, %v1948_v33  ;;  %v1949_v57 = vmax.f32 %v1941_v8, 0.0  ;;  %v1942_v10 = vsub.f32 %v1926_v43, %v1934_v18 }
 0x499   : > { %v1976_v21 = vmul.f32 %v3105_v22, %v1952_v39  ;;  %v1998_v15 = vpack.c.bf16 %v1992_v58, %v1991_v30  ;;  %v1989_v12 = vmul.f32 %v4402_v19, %v1975_v31  ;;  %v1957_v8 = vsub.f32 %v4342_v54, %v4387_v59 }
 0x49a   : > { %3108 = vrsqrt.f32 %v1964_v20  ;;  %v1965_v56 = vadd.f32 1e-05, %v1949_v57  ;;  %v1950_v35 = vmax.f32 %v1942_v10, 0.0  ;;  %v1958_v43 = vsub.f32 %v4345_v13, %v4392_v24 }
 0x49b   : > { %v1990_v6 = vmul.f32 %v4402_v19, %v1976_v21  ;;  %v2089_v3 = vunpack.c.h.bf16 %v1998_v15  ;;  %v2088_v14 = vunpack.c.l.bf16 %v1998_v15 }
 0x49c   : > { %3110 = vrsqrt.f32 %v1965_v56  ;;  %v1966_v63 = vadd.f32 1e-05, %v1950_v35 }
 0x49d   : > { %v1997_v11 = vpack.c.bf16 %v1990_v6, %v1989_v12  ;;  %v2097_v4 = vmul.f32 %v2089_v3, %v2089_v3  ;;  %v2096_v48 = vmul.f32 %v2088_v14, %v2088_v14 }
 0x49e   : > { %3112 = vrsqrt.f32 %v1966_v63 }
 0x49f   : > { %2829 = vmatprep.mubr.msk.bf16.mxu1 %vm924_vm5, %v1997_v11  ;;  %v2111_v0 = vsel %vm924_vm5, %v2097_v4, 0.0  ;;  %v2108_v62 = vsel %vm924_vm5, %v2096_v48, 0.0  ;;  %v2087_v44 = vunpack.c.h.bf16 %v1997_v11  ;;  %v2086_v2 = vunpack.c.l.bf16 %v1997_v11 }
 0x4a0   : > { %2112 = vadd.xlane.f32.xlu1 %v2111_v0  ;;  %2109 = vadd.xlane.f32.xlu0 %v2108_v62 }
 0x4a1   : > { %2830 = vmatmul.mubr.msk.bf16.vlgmr.msra.gmra.mrb[8].mxu1 %vm924_vm5, %v1998_v15  ;;  %v2095_v46 = vmul.f32 %v2087_v44, %v2087_v44  ;;  %v2094_v40 = vmul.f32 %v2086_v2, %v2086_v2 }
 0x4a2   : > { %v3107_v18 = vpop.eup %3106 }
 0x4a3   : > { %v2105_v1 = vsel %vm924_vm5, %v2095_v46, 0.0  ;;  %v2102_v25 = vsel %vm924_vm5, %v2094_v40, 0.0  ;;  %v1979_v52 = vmul.f32 %v3107_v18, %v1955_v27 }
 0x4a4   : > { %v3109_v33 = vpop.eup %3108  ;;  %2106 = vadd.xlane.f32.xlu1 %v2105_v1  ;;  %2103 = vadd.xlane.f32.xlu0 %v2102_v25 }
 0x4a5   : > { %v1980_v26 = vmul.f32 %v3109_v33, %v1956_v36  ;;  %v1993_v39 = vmul.f32 %v4402_v19, %v1979_v52 }
 0x4a6   : > { %v3111_v16 = vpop.eup %3110 }
 0x4a7   : > { %v1994_v55 = vmul.f32 %v4402_v19, %v1980_v26  ;;  %v1981_v50 = vmul.f32 %v3111_v16, %v1957_v8 }
 0x4a8   : > { %v3113_v31 = vpop.eup %3112 }
 0x4a9   : > { %v1999_v30 = vpack.c.bf16 %v1994_v55, %v1993_v39  ;;  %v1982_v58 = vmul.f32 %v3113_v31, %v1958_v43  ;;  %v1995_v22 = vmul.f32 %v4402_v19, %v1981_v50 }
 0x4ab   : > { %2833 = vmatprep.mubr.msk.bf16.mxu1 %vm924_vm5, %v1999_v30  ;;  %v1996_v20 = vmul.f32 %v4402_v19, %v1982_v58  ;;  %v2091_v54 = vunpack.c.h.bf16 %v1999_v30  ;;  %v2090_v59 = vunpack.c.l.bf16 %v1999_v30 }
 0x4ad   : > { %v2000_v57 = vpack.c.bf16 %v1996_v20, %v1995_v22  ;;  %v2099_v10 = vmul.f32 %v2091_v54, %v2091_v54  ;;  %v2098_v21 = vmul.f32 %v2090_v59, %v2090_v59 }
 0x4af   : > { %2834 = vmatmul.mubr.msk.bf16.gmra.mrb[12].mxu1 %vm924_vm5, %v2000_v57  ;;  %v2117_v13 = vsel %vm924_vm5, %v2099_v10, 0.0  ;;  %v2114_v24 = vsel %vm924_vm5, %v2098_v21, 0.0  ;;  %v2093_v15 = vunpack.c.h.bf16 %v2000_v57  ;;  %v2092_v56 = vunpack.c.l.bf16 %v2000_v57 }
 0x4b0   : > { %2118 = vadd.xlane.f32.xlu1 %v2117_v13  ;;  %2115 = vadd.xlane.f32.xlu0 %v2114_v24 }
 0x4b1   : > { %v2101_v35 = vmul.f32 %v2093_v15, %v2093_v15  ;;  %v2100_v12 = vmul.f32 %v2092_v56, %v2092_v56 }
 0x4b3   : > { %v2123_v6 = vsel %vm924_vm5, %v2101_v35, 0.0  ;;  %v2120_v19 = vsel %vm924_vm5, %v2100_v12, 0.0 }
 0x4b4   : > { %2124 = vadd.xlane.f32.xlu1 %v2123_v6  ;;  %2121 = vadd.xlane.f32.xlu0 %v2120_v19 }
 0x52d   : > { %v2110_v3 = vpop.xlane.xlu0 %2109  ;;  %v2113_v14 = vpop.xlane.xlu1 %2112 }
 0x52e   : > { %v2145_v63 = vadd.f32 1e-06, %v2110_v3  ;;  %v2146_v48 = vadd.f32 1e-06, %v2113_v14 }
 0x530   : > { %3114 = vrsqrt.f32 %v2145_v63 }
 0x531   : > { %v2104_v11 = vpop.xlane.xlu0 %2103  ;;  %v2107_v4 = vpop.xlane.xlu1 %2106  ;;  %3116 = vrsqrt.f32 %v2146_v48 }
 0x532   : > { %v2143_v0 = vadd.f32 1e-06, %v2104_v11  ;;  %v2144_v62 = vadd.f32 1e-06, %v2107_v4 }
 0x534   : > { %3118 = vrsqrt.f32 %v2143_v0 }
 0x535   : > { %3120 = vrsqrt.f32 %v2144_v62 }
 0x53a   : > { %v3115_v40 = vpop.eup %3114 }
 0x53b   : > { %v3117_v1 = vpop.eup %3116  ;;  %v2161_v26 = vmul.f32 25.0, %v3115_v40 }
 0x53c   : > { %v2162_v58 = vmul.f32 25.0, %v3117_v1 }
 0x53d   : > { %v2116_v44 = vpop.xlane.xlu0 %2115  ;;  %v2119_v2 = vpop.xlane.xlu1 %2118 }
 0x53e   : > { %v3119_v8 = vpop.eup %3118  ;;  %v2147_v55 = vadd.f32 1e-06, %v2116_v44  ;;  %v2148_v21 = vadd.f32 1e-06, %v2119_v2 }
 0x53f   : > { %v3121_v39 = vpop.eup %3120  ;;  %v2159_v54 = vmul.f32 25.0, %v3119_v8 }
 0x540   : > { %v2160_v10 = vmul.f32 25.0, %v3121_v39 }
 0x541   : > { %v2122_v27 = vpop.xlane.xlu0 %2121  ;;  %v2125_v46 = vpop.xlane.xlu1 %2124 }
 0x542   : > { %v2149_v18 = vadd.f32 1e-06, %v2122_v27  ;;  %v2150_v25 = vadd.f32 1e-06, %v2125_v46 }
 0x544   : > { %3122 = vrsqrt.f32 %v2149_v18 }
 0x545   : > { %3124 = vrsqrt.f32 %v2150_v25 }
 0x546   : > { %3126 = vrsqrt.f32 %v2147_v55 }
 0x547   : > { %3128 = vrsqrt.f32 %v2148_v21 }
 0x54e   : > { %v3123_v3 = vpop.eup %3122 }
 0x54f   : > { %v3125_v4 = vpop.eup %3124  ;;  %v2165_v2 = vmul.f32 25.0, %v3123_v3 }
 0x550   : > { %v3127_v40 = vpop.eup %3126 }
 0x551   : > { %v3129_v55 = vpop.eup %3128 }
 0x574   : > { %v2831_v36 = vpop.f32.mrb[8].mxu1 }
 0x575   : > { %v2129_v52 = vand.u32 2147483647, %v2831_v36  ;;  %v2055_v33 = vpop.f32.mrb[9].mxu1 }
 0x576   : > { %v2127_v16 = vand.u32 2147483647, %v2055_v33  ;;  %v2832_v43 = vpop.f32.mrb[10].mxu1 }
 0x577   : > { %v2137_v50 = vmul.f32 %v2831_v36, %v2129_v52  ;;  %v2130_v31 = vand.u32 2147483647, %v2832_v43  ;;  %v2058_v30 = vpop.f32.mrb[11].mxu1 }
 0x578   : > { %v2135_v22 = vmul.f32 %v2127_v16, %v2055_v33  ;;  %v2128_v20 = vand.u32 2147483647, %v2058_v30  ;;  %v2166_v33 = vmul.f32 25.0, %v3125_v4  ;;  %v3146_v4 = vld [vmem:[%s3679_s8] sm:$0xf]  ;;  %s4738_s8 = sld [smem:[#allocation12_spill]] }
 0x579   : > { %v4438_v59 = vmul.f32 %v2161_v26, %v2137_v50  ;;  %v2138_v57 = vmul.f32 %v2832_v43, %v2130_v31  ;;  %v2163_v50 = vmul.f32 25.0, %v3127_v40 }
 0x57a   : > { %v2136_v13 = vmul.f32 %v2128_v20, %v2058_v30  ;;  %v4440_v24 = vmul.f32 %v2159_v54, %v2135_v22  ;;  %v2164_v20 = vmul.f32 25.0, %v3129_v55 }
 0x57b   : > { %v4442_v15 = vmul.f32 %v2162_v58, %v2138_v57  ;;  %v2181_v56 = vsel %vm592_vm2, %v4438_v59, 0.0  ;;  %v2201_v19 = vmul.f32 %v4438_v59, %v4438_v59 }
 0x57c   : > { %2182 = vadd.xlane.f32.xlu0 %v2181_v56  ;;  %v4446_v35 = vmul.f32 %v2160_v10, %v2136_v13  ;;  %v2175_v6 = vsel %vm592_vm2, %v4440_v24, 0.0  ;;  %v2199_v44 = vmul.f32 %v4440_v24, %v4440_v24 }
 0x57d   : > { %v2184_v12 = vsel %vm592_vm2, %v4442_v15, 0.0  ;;  %v2202_v63 = vmul.f32 %v4442_v15, %v4442_v15  ;;  %v2213_v62 = vsel %vm592_vm2, %v2201_v19, 0.0 }
 0x57e   : > { %2185 = vadd.xlane.f32.xlu1 %v2184_v12  ;;  %v2178_v14 = vsel %vm592_vm2, %v4446_v35, 0.0  ;;  %v2200_v52 = vmul.f32 %v4446_v35, %v4446_v35  ;;  %v2207_v39 = vsel %vm592_vm2, %v2199_v44, 0.0  ;;  %s2622_s6 = sshll.u32 %s4738_s8, 3 }
 0x57f   : > { %v2216_v1 = vsel %vm592_vm2, %v2202_v63, 0.0  ;;  %p489_p7 = scmp.lt.s32.totalorder %s2622_s6, 31 }
 0x580   : > { %2176 = vadd.xlane.f32.xlu0 %v2175_v6  ;;  %v2210_v58 = vsel %vm592_vm2, %v2200_v52, 0.0 }
 0x581   : > { %s4775_s6 = smov (!%p489_p7, %s2622_s6), 31 }
 0x582   : > { %2179 = vadd.xlane.f32.xlu1 %v2178_v14  ;;  %v2835_v11 = vpop.f32.mrb[12].mxu1  ;;  %s4524_s19 = sadd.s32 %s2623_s12, %s4775_s6 }
 0x583   : > { %v2133_v48 = vand.u32 2147483647, %v2835_v11  ;;  %v2071_v0 = vpop.f32.mrb[13].mxu1  ;;  %s2624_s3 = sshll.u32 %s4524_s19, 3 }
 0x584   : > { %v2131_v27 = vand.u32 2147483647, %v2071_v0  ;;  %2214 = vadd.xlane.f32.xlu0 %v2213_v62  ;;  %v2836_v46 = vpop.f32.mrb[14].mxu1  ;;  %s4569_s5 = scalar_lea.vmem %s4741_s29, %s2624_s3 }
 0x585   : > { %v2141_v18 = vmul.f32 %v2835_v11, %v2133_v48  ;;  %v2134_v36 = vand.u32 2147483647, %v2836_v46  ;;  %v2074_v25 = vpop.f32.mrb[15].mxu1  ;;  %v2393_v48 = vshrl.u32 %v3146_v4, 16 }
 0x586   : > { %2217 = vadd.xlane.f32.xlu1 %v2216_v1  ;;  %v2132_v8 = vand.u32 2147483647, %v2074_v25  ;;  %v2139_v16 = vmul.f32 %v2131_v27, %v2071_v0  ;;  %v2396_v0 = vshll.u32 %v3146_v4, 16 }
 0x587   : > { %v4464_v26 = vmul.f32 %v2165_v2, %v2141_v18  ;;  %v2142_v43 = vmul.f32 %v2836_v46, %v2134_v36  ;;  %v2395_v62 = vrot.slane %v2393_v48, 4 }
 0x588   : > { %2208 = vadd.xlane.f32.xlu0 %v2207_v39  ;;  %v2140_v30 = vmul.f32 %v2132_v8, %v2074_v25  ;;  %v4472_v54 = vmul.f32 %v2163_v50, %v2139_v16  ;;  %v2398_v44 = vrot.slane %v2396_v0, 5 }
 0x589   : > { %v4467_v31 = vmul.f32 %v2166_v33, %v2142_v43  ;;  %v2193_v22 = vsel %vm592_vm2, %v4464_v26, 0.0  ;;  %v2205_v19 = vmul.f32 %v4464_v26, %v4464_v26 }
 0x58a   : > { %2211 = vadd.xlane.f32.xlu1 %v2210_v58  ;;  %v4476_v10 = vmul.f32 %v2164_v20, %v2140_v30  ;;  %v2187_v21 = vsel %vm592_vm2, %v4472_v54, 0.0  ;;  %v2203_v13 = vmul.f32 %v4472_v54, %v4472_v54  ;;  %v2399_v2 = vor.u32 %v2398_v44, %v2395_v62 }
 0x58b   : > { %v2196_v57 = vsel %vm592_vm2, %v4467_v31, 0.0  ;;  %v2206_v14 = vmul.f32 %v4467_v31, %v4467_v31  ;;  %v2225_v63 = vsel %vm592_vm2, %v2205_v19, 0.0 }
 0x58c   : > { %2194 = vadd.xlane.f32.xlu0 %v2193_v22  ;;  %v2190_v56 = vsel %vm592_vm2, %v4476_v10, 0.0  ;;  %v2204_v12 = vmul.f32 %v4476_v10, %v4476_v10  ;;  %v2219_v6 = vsel %vm592_vm2, %v2203_v13, 0.0  ;;  %v4495_v27 = vrot.slane %v2399_v2, 4 }
 0x58d   : > { %v2228_v11 = vsel %vm592_vm2, %v2206_v14, 0.0 }
 0x58e   : > { %2197 = vadd.xlane.f32.xlu1 %v2196_v57  ;;  %v2222_v3 = vsel %vm592_vm2, %v2204_v12, 0.0  ;;  %v2405_v46 = vsel %vm3758_vm4, %v4495_v27, %v3848_v51 }
 0x590   : > { %2188 = vadd.xlane.f32.xlu0 %v2187_v21 }
 0x592   : > { %2191 = vadd.xlane.f32.xlu1 %v2190_v56 }
 0x594   : > { %2220 = vadd.xlane.f32.xlu0 %v2219_v6 }
 0x596   : > { %2223 = vadd.xlane.f32.xlu1 %v2222_v3 }
 0x598   : > { %2226 = vadd.xlane.f32.xlu0 %v2225_v63 }
 0x59a   : > { %2229 = vadd.xlane.f32.xlu1 %v2228_v11 }
 0x609   : > { %v2183_v40 = vpop.xlane.xlu0 %2182 }
 0x60a   : > { %v4501_v1 = vmul.f32 0.015625, %v2183_v40 }
 0x60b   : > { %v2186_v18 = vpop.xlane.xlu1 %2185 }
 0x60c   : > { %v4503_v52 = vmul.f32 0.015625, %v2186_v18  ;;  %v2249_v8 = vmul.f32 %v4501_v1, %v4501_v1 }
 0x60d   : > { %v2177_v36 = vpop.xlane.xlu0 %2176 }
 0x60e   : > { %v4507_v16 = vmul.f32 0.015625, %v2177_v36  ;;  %v2250_v50 = vmul.f32 %v4503_v52, %v4503_v52  ;;  %v2274_v32 = vsub.f32 %v4442_v15, %v4503_v52 }
 0x60f   : > { %v2180_v25 = vpop.xlane.xlu1 %2179 }
 0x610   : > { %v4509_v39 = vmul.f32 0.015625, %v2180_v25  ;;  %v2247_v20 = vmul.f32 %v4507_v16, %v4507_v16  ;;  %v2271_v42 = vsub.f32 %v4440_v24, %v4507_v16 }
 0x611   : > { %v2215_v33 = vpop.xlane.xlu0 %2214 }
 0x612   : > { %v2241_v43 = vmul.f32 0.015625, %v2215_v33  ;;  %v2248_v56 = vmul.f32 %v4509_v39, %v4509_v39  ;;  %v2272_v24 = vsub.f32 %v4446_v35, %v4509_v39 }
 0x613   : > { %v2218_v55 = vpop.xlane.xlu1 %2217 }
 0x614   : > { %v2257_v30 = vsub.f32 %v2241_v43, %v2249_v8  ;;  %v2242_v58 = vmul.f32 0.015625, %v2218_v55 }
 0x615   : > { %v2209_v22 = vpop.xlane.xlu0 %2208 }
 0x616   : > { %v2265_v57 = vmax.f32 %v2257_v30, 0.0  ;;  %v2258_v21 = vsub.f32 %v2242_v58, %v2250_v50  ;;  %v2239_v13 = vmul.f32 0.015625, %v2209_v22  ;;  %v2273_v50 = vsub.f32 %v4438_v59, %v4501_v1 }
 0x617   : > { %v2212_v12 = vpop.xlane.xlu1 %2211  ;;  %v2426_v1 = vunpack.c.l.bf16 %v2357_v49 }
 0x618   : > { %v2281_v6 = vadd.f32 1e-05, %v2265_v57  ;;  %v2266_v19 = vmax.f32 %v2258_v21, 0.0  ;;  %v2255_v3 = vsub.f32 %v2239_v13, %v2247_v20  ;;  %v2240_v14 = vmul.f32 0.015625, %v2212_v12  ;;  %v4542_v57 = vld [vmem:[%s4740_s4] ss:$0 sm:$0xff] }
 0x619   : > { %v2195_v63 = vpop.xlane.xlu0 %2194  ;;  %v2424_v20 = vunpack.c.l.bf16 %v2333_v41 }
 0x61a   : > { %3130 = vrsqrt.f32 %v2281_v6  ;;  %v2282_v11 = vadd.f32 1e-05, %v2266_v19  ;;  %v2263_v4 = vmax.f32 %v2255_v3, 0.0  ;;  %v2256_v48 = vsub.f32 %v2240_v14, %v2248_v56 }
 0x61b   : > { %v2198_v0 = vpop.xlane.xlu1 %2197  ;;  %v4526_v8 = vmul.f32 0.015625, %v2195_v63 }
 0x61c   : > { %3132 = vrsqrt.f32 %v2282_v11  ;;  %v2279_v62 = vadd.f32 1e-05, %v2263_v4  ;;  %v2264_v44 = vmax.f32 %v2256_v48, 0.0  ;;  %v4532_v30 = vmul.f32 0.015625, %v2198_v0 }
 0x61d   : > { %v2189_v2 = vpop.xlane.xlu0 %2188  ;;  %v2253_v6 = vmul.f32 %v4526_v8, %v4526_v8 }
 0x61e   : > { %3134 = vrsqrt.f32 %v2279_v62  ;;  %v2280_v40 = vadd.f32 1e-05, %v2264_v44  ;;  %v4520_v18 = vmul.f32 0.015625, %v2189_v2  ;;  %v2254_v53 = vmul.f32 %v4532_v30, %v4532_v30 }
 0x61f   : > { %v2192_v36 = vpop.xlane.xlu1 %2191 }
 0x620   : > { %3136 = vrsqrt.f32 %v2280_v40  ;;  %v4522_v25 = vmul.f32 0.015625, %v2192_v36  ;;  %v2251_v43 = vmul.f32 %v4520_v18, %v4520_v18  ;;  %v2425_v40 = vunpack.c.l.bf16 %v2343_v45 }
 0x621   : > { %v2221_v33 = vpop.xlane.xlu0 %2220  ;;  %v2275_v38 = vsub.f32 %v4472_v54, %v4520_v18  ;;  %v2277_v54 = vsub.f32 %v4464_v26, %v4526_v8  ;;  %v4744_v8 = vsel %vm3758_vm4, %v3856_v7, %v3858_v5 }
 0x622   : > { %v2243_v55 = vmul.f32 0.015625, %v2221_v33  ;;  %v2252_v21 = vmul.f32 %v4522_v25, %v4522_v25 }
 0x623   : > { %v2224_v58 = vpop.xlane.xlu1 %2223 }
 0x624   : > { %v3131_v22 = vpop.eup %3130  ;;  %v2259_v13 = vsub.f32 %v2243_v55, %v2251_v43  ;;  %v2244_v59 = vmul.f32 0.015625, %v2224_v58 }
 0x625   : > { %v2297_v41 = vmul.f32 %v3131_v22, %v2273_v50  ;;  %v2227_v56 = vpop.xlane.xlu0 %2226  ;;  %v4742_v22 = vsel %vm3758_vm4, %v3802_v61, %v3809_v9 }
 0x626   : > { %v3133_v12 = vpop.eup %3132  ;;  %v2267_v19 = vmax.f32 %v2259_v13, 0.0  ;;  %v2260_v3 = vsub.f32 %v2244_v59, %v2252_v21  ;;  %v2245_v34 = vmul.f32 0.015625, %v2227_v56  ;;  %v2276_v21 = vsub.f32 %v4476_v10, %v4522_v25 }
 0x627   : > { %v2311_v49 = vmul.f32 %v4542_v57, %v2297_v41  ;;  %v2298_v47 = vmul.f32 %v3133_v12, %v2274_v32  ;;  %v2230_v60 = vpop.xlane.xlu1 %2229  ;;  %v2430_v10 = vunpack.c.l.bf16 %v2405_v46  ;;  %v2431_v41 = vunpack.c.l.bf16 %v4744_v8 }
 0x628   : > { %v3135_v15 = vpop.eup %3134  ;;  %v2283_v52 = vadd.f32 1e-05, %v2267_v19  ;;  %v2268_v14 = vmax.f32 %v2260_v3, 0.0  ;;  %v2261_v63 = vsub.f32 %v2245_v34, %v2253_v6  ;;  %v2246_v11 = vmul.f32 0.015625, %v2230_v60 }
 0x629   : > { %v2434_v16 = vadd.f32 %v2426_v1, %v2311_v49  ;;  %v2312_v4 = vmul.f32 %v4542_v57, %v2298_v47  ;;  %v2295_v48 = vmul.f32 %v3135_v15, %v2271_v42  ;;  %v4743_v1 = vsel %vm3758_vm4, %v3826_v29, %v3822_v23 }
 0x62a   : > { %v3137_v0 = vpop.eup %3136  ;;  %3138 = vrsqrt.f32 %v2283_v52  ;;  %v2284_v62 = vadd.f32 1e-05, %v2268_v14  ;;  %v2269_v44 = vmax.f32 %v2261_v63, 0.0  ;;  %v2262_v2 = vsub.f32 %v2246_v11, %v2254_v53 }
 0x62b   : > { %2442 = vst.msk [vmem:[%s4569_s5 + $0x10] sm:$0xff] %vm592_vm2, %v2434_v16  ;;  %v2435_v35 = vadd.f32 %v2427_v17, %v2312_v4  ;;  %v2309_v39 = vmul.f32 %v4542_v57, %v2295_v48  ;;  %v2296_v36 = vmul.f32 %v3137_v0, %v2272_v24  ;;  %v2429_v17 = vunpack.c.l.bf16 %v4743_v1 }
 0x62c   : > { %3140 = vrsqrt.f32 %v2284_v62  ;;  %v2285_v33 = vadd.f32 1e-05, %v2269_v44  ;;  %v2270_v43 = vmax.f32 %v2262_v2, 0.0  ;;  %v2278_v23 = vsub.f32 %v4467_v31, %v4532_v30 }
 0x62d   : > { %2443 = vst.msk [vmem:[%s4569_s5 + $0x18] sm:$0xff] %vm592_vm2, %v2435_v35  ;;  %v2432_v55 = vadd.f32 %v2424_v20, %v2309_v39  ;;  %v2310_v50 = vmul.f32 %v4542_v57, %v2296_v36  ;;  %v2428_v20 = vunpack.c.l.bf16 %v4742_v22 }
 0x62e   : > { %3142 = vrsqrt.f32 %v2285_v33  ;;  %v2286_v58 = vadd.f32 1e-05, %v2270_v43 }
 0x62f   : > { %2440 = vst.msk [vmem:[%s4569_s5] sm:$0xff] %vm592_vm2, %v2432_v55  ;;  %v2433_v28 = vadd.f32 %v2425_v40, %v2310_v50 }
 0x630   : > { %3144 = vrsqrt.f32 %v2286_v58 }
 0x631   : > { %2441 = vst.msk [vmem:[%s4569_s5 + $0x8] sm:$0xff] %vm592_vm2, %v2433_v28 }
 0x634   : > { %v3139_v45 = vpop.eup %3138 }
 0x635   : > { %v2299_v13 = vmul.f32 %v3139_v45, %v2275_v38 }
 0x636   : > { %v3141_v59 = vpop.eup %3140 }
 0x637   : > { %v2313_v18 = vmul.f32 %v4542_v57, %v2299_v13  ;;  %v2300_v61 = vmul.f32 %v3141_v59, %v2276_v21 }
 0x638   : > { %v3143_v9 = vpop.eup %3142 }
 0x639   : > { %v2436_v29 = vadd.f32 %v2428_v20, %v2313_v18  ;;  %v2314_v25 = vmul.f32 %v4542_v57, %v2300_v61  ;;  %v2301_v32 = vmul.f32 %v3143_v9, %v2277_v54 }
 0x63a   : > { %v3145_v26 = vpop.eup %3144 }
 0x63b   : > { %2444 = vst.msk [vmem:[%s4569_s5 + $0x20] sm:$0xff] %vm592_vm2, %v2436_v29  ;;  %v2437_v56 = vadd.f32 %v2429_v17, %v2314_v25  ;;  %v2315_v51 = vmul.f32 %v4542_v57, %v2301_v32  ;;  %v2302_v27 = vmul.f32 %v3145_v26, %v2278_v23 }
 0x63d   : > { %2445 = vst.msk [vmem:[%s4569_s5 + $0x28] sm:$0xff] %vm592_vm2, %v2437_v56  ;;  %v2438_v31 = vadd.f32 %v2430_v10, %v2315_v51  ;;  %v2316_v46 = vmul.f32 %v4542_v57, %v2302_v27 }
 0x63f   : > { %2446 = vst.msk [vmem:[%s4569_s5 + $0x30] sm:$0xff] %vm592_vm2, %v2438_v31  ;;  %v2439_v30 = vadd.f32 %v2431_v41, %v2316_v46 }
 0x641   : > { %2447 = vst.msk [vmem:[%s4569_s5 + $0x38] sm:$0xff] %vm592_vm2, %v2439_v30 }
 0x642 PF: > { %s25_s22 = sadd.s32 1, %s3357_s22   ;;  %s4746_s26 = sld [smem:[#allocation10_spill]] }
 0x643   : > { %p4630_p13 = scmp.ge.s32.totalorder %s25_s22, 10   ;;  %s4747_s15 = sld [smem:[#allocation18_spill]] }
 0x644   : > { %s4748_s18 = sld [smem:[#allocation17_spill]]  ;;  %s4749_s7 = sld [smem:[#allocation11_spill]] }
 0x645   : > { %s4750_s17 = sld [smem:[#allocation16_spill]]  ;;  %s4751_s28 = sld [smem:[#allocation14_spill]] }
 0x646   : > { %s4752_s8 = sld [smem:[#allocation15_spill]]  ;;  %s4755_s10 = smov %s3313_s11 }
 0x647   : > { %s4757_s12 = smov %s3321_s13  ;;  %s4758_s13 = smov %s3325_s14 }
 0x648   : > { %s4754_s30 = smov %s4746_s26  ;;  %s4763_s19 = smov %s3353_s21 }
 0x649   : > { %s4756_s11 = smov %s4747_s15  ;;  %s4760_s15 = smov %s3333_s16 }
 0x64a   : > { %s4759_s14 = smov %s4748_s18  ;;  %s4761_s16 = smov %s4749_s7 }
 0x64b   : > { %s4762_s18 = smov %s3349_s20  ;;  %s4764_s20 = smov %s4751_s28 }
 0x64c   : > { %s4765_s21 = smov %s4752_s8  ;;  %24 = sbr.rel (!%p4630_p13) target bundleno = 18 (0x12), region = 122 }
 0x653   :  { %2478 = vsyncpa [#allocation3], 1 }
 0x654   :  { %2480 = vsyncpa [#allocation3 + $0x1], 1 }
 0x655   :  { %2481 = vsyncpa [#allocation5], 1 }
 0x656   :  { %2483 = vsyncpa [#allocation5 + $0x1], 1 }

</bundles_post_ra>
